<compile_context>
chip_gen: v7x
topology: tpu7x:2x2x1
jax: 0.10.0
libtpu: 0.0.40
codegen_flags: <defaults>
</compile_context>

<pallas_src>
import math

import jax
import jax.numpy as jnp
from jax.experimental import pallas as pl
from jax.experimental.pallas import tpu as pltpu

# ----- small, module-consistent shapes (scaled down from the reference config) -----
B = 2            # batch
T = 8            # sequence length
D = 128          # model_dim  (multiple of 128 -> lane-dense stores)
H = 4            # num_heads
DPH = D // H     # dim per head
FFN = 256        # ffn_dim
LAYERS = 2       # num_layers
VOCAB = 100
MAX_LEN = 64
EPS = 1e-5       # PyTorch nn.LayerNorm default

M = B * T        # flattened (batch*time) rows
MH = M * H       # rows after the PyTorch `.view(B*H, -1, dph)` head split
NEG = -1e30


# ----------------------- fused encoder-stack kernel -----------------------

def _encoder_stack_kernel(x_ref, perm_ref, mask_ref,
                          wqkv_ref, bqkv_ref, wf_ref, bf_ref,
                          w1_ref, b1_ref, w2_ref, b2_ref,
                          lng_ref, lnb_ref,
                          out_ref, attn_ref, h_ref):
    """One grid step == one EncoderLayer; weights + activations stay in VMEM."""
    layer = pl.program_id(0)
    f32 = jnp.float32

    # Layer 0: load the (embedded + positionally encoded) activations into the carry.
    @pl.when(layer == 0)
    def _():
        h_ref[...] = x_ref[...]

    x = h_ref[...]                                              # (M, D)

    # ---- MultiHeadAttention: fused QKV projection (one (D, 3D) matmul) ----
    qkv = jnp.dot(x, wqkv_ref[...], preferred_element_type=f32) + bqkv_ref[...]
    q2 = qkv[:, 0:D]
    k2 = qkv[:, D:2 * D]
    v2 = qkv[:, 2 * D:3 * D]

    # PyTorch `.view(B*H, -1, dph)` head split, expressed reshape-free:
    # stack the H lane-chunks along rows, then permute rows into (head, seq) order.
    perm = perm_ref[...]                                        # (MH, MH) 0/1 matrix

    def head_rows(z):                                           # (M, D) -> (MH, DPH)
        zs = jnp.concatenate([z[:, c * DPH:(c + 1) * DPH] for c in range(H)], axis=0)
        return jnp.dot(perm, zs, preferred_element_type=f32)

    qh = head_rows(q2)
    kh = head_rows(k2)
    vh = head_rows(v2)

    # ---- all heads in a single MXU matmul; block-diag mask keeps heads independent ----
    # (1/sqrt(dph) is folded into the Q projection weights/bias at init.)
    s = jax.lax.dot_general(qh, kh, (((1,), (1,)), ((), ())),
                            preferred_element_type=f32) + mask_ref[...]    # (MH, MH)
    mx = jnp.max(s, axis=-1, keepdims=True)
    e = jnp.exp(s - mx)
    a = e * pl.reciprocal(jnp.sum(e, axis=-1, keepdims=True), approx=True)

    # per-head (T, T) attention maps (diagonal blocks), as returned by the reference
    for p in range(B * H):
        attn_ref[p, :, :] = a[p * T:(p + 1) * T, p * T:(p + 1) * T]

    ctxh = jnp.dot(a, vh, preferred_element_type=f32)                       # (MH, DPH)
    # inverse of the quirky view: un-permute rows (P^T @ ctxh), re-merge lane chunks
    ctxs = jax.lax.dot_general(perm, ctxh, (((0,), (0,)), ((), ())),
                               preferred_element_type=f32)                  # (MH, DPH)
    ctx = jnp.concatenate([ctxs[c * M:(c + 1) * M, :] for c in range(H)], axis=1)  # (M, D)

    # ---- final projection + residual (MultiHeadAttention output) ----
    att = jnp.dot(ctx, wf_ref[...], preferred_element_type=f32) + bf_ref[...] + x

    # ---- PositionwiseFeedForward: layer_norm(w2(relu(w1(x))) + x) ----
    hh = jnp.maximum(jnp.dot(att, w1_ref[...], preferred_element_type=f32) + b1_ref[...], 0.0)
    ff = jnp.dot(hh, w2_ref[...], preferred_element_type=f32) + b2_ref[...]
    y = ff + att
    mu = jnp.mean(y, axis=-1, keepdims=True)
    var = jnp.mean((y - mu) * (y - mu), axis=-1, keepdims=True)             # biased (PyTorch LN)
    out = (y - mu) * jax.lax.rsqrt(var + EPS) * lng_ref[...] + lnb_ref[...]

    h_ref[...] = out        # carry to next layer (persists across grid steps)
    out_ref[...] = out      # resident output block, flushed once at the end


def encoder_stack(x2d, perm, mask, p):
    def const_spec(shape):
        return pl.BlockSpec(shape, lambda l: (0,) * len(shape))

    def layer_spec(shape):  # per-layer weights: leading layer dim squeezed away
        return pl.BlockSpec((None,) + shape, lambda l: (l,) + (0,) * len(shape))

    return pl.pallas_call(
        _encoder_stack_kernel,
        grid=(LAYERS,),
        in_specs=[const_spec((M, D)), const_spec((MH, MH)), const_spec((MH, MH)),
                  layer_spec((D, 3 * D)), layer_spec((1, 3 * D)),
                  layer_spec((D, D)), layer_spec((1, D)),
                  layer_spec((D, FFN)), layer_spec((1, FFN)),
                  layer_spec((FFN, D)), layer_spec((1, D)),
                  layer_spec((1, D)), layer_spec((1, D))],
        out_specs=(pl.BlockSpec((M, D), lambda l: (0, 0)),
                   pl.BlockSpec((None, B * H, T, T), lambda l: (l, 0, 0, 0))),
        out_shape=(jax.ShapeDtypeStruct((M, D), jnp.float32),
                   jax.ShapeDtypeStruct((LAYERS, B * H, T, T), jnp.float32)),
        scratch_shapes=[pltpu.VMEM((M, D), jnp.float32)],
        compiler_params=pltpu.CompilerParams(dimension_semantics=("arbitrary",)),
    )(x2d, perm, mask, p['wqkv'], p['bqkv'], p['wf'], p['bf'],
      p['w1'], p['b1'], p['w2'], p['b2'], p['ln_g'], p['ln_b'])


# ----------------------- model glue (plain JAX) -----------------------

def encoder_forward(params, inputs_ids, inputs_len):
    # `inputs_len` is accepted but unused, exactly as in the reference.
    # TODO(synk): embedding gather is data-dependent; kept in plain JAX (XLA gather).
    x = jnp.take(params['embedding'], inputs_ids, axis=0)          # (B, T, D)
    x = x + params['pe'][:, :inputs_ids.shape[1], :]               # positional encoding
    # dropout: identity (eval-mode).
    # padding_mask(inputs, inputs) is computed by the reference but never used by
    # MultiHeadAttention.forward, so it has no effect on the outputs.
    out2d, attn_all = encoder_stack(x.reshape(M, D), params['perm'], params['mask'],
                                    params['stacked'])
    outputs = out2d.reshape(B, T, D)
    attentions = [attn_all[l] for l in range(LAYERS)]
    return outputs, attentions


# ----------------------- deterministic parameter / constant init -----------------------

def make_positional_encoding(max_len, model_dim):
    position = jnp.arange(max_len, dtype=jnp.float32)[:, None]
    div_term = jnp.exp(jnp.arange(0, model_dim, 2, dtype=jnp.float32)
                       * (-math.log(10000.0) / model_dim))
    pe = jnp.zeros((max_len, model_dim), dtype=jnp.float32)
    pe = pe.at[:, 0::2].set(jnp.sin(position * div_term))
    pe = pe.at[:, 1::2].set(jnp.cos(position * div_term))
    return pe[None]                                                # (1, max_len, D)


def make_head_permutation():
    # Row y = H*r + c of the quirky (B*H*T, dph) view comes from row c*M + r of the
    # lane-chunk stack:  P[y, c*M + r] = 1.
    rows = jnp.arange(MH)
    r = rows // H
    c = rows % H
    src = c * M + r
    return jax.nn.one_hot(src, MH, dtype=jnp.float32)              # (MH, MH)


def make_head_mask():
    # Additive mask: 0 within the same (batch*head) block of T rows, -1e30 elsewhere.
    head = jnp.arange(MH) // T
    same = head[:, None] == head[None, :]
    return jnp.where(same, 0.0, NEG).astype(jnp.float32)           # (MH, MH)


def init_params(key):
    k_emb, *lkeys = jax.random.split(key, 1 + LAYERS)

    def dense(k, din, dout, scale=1.0):
        kw, kb = jax.random.split(k)
        w = jax.random.normal(kw, (din, dout), jnp.float32) * 0.02 * scale
        b = jax.random.normal(kb, (1, dout), jnp.float32) * 0.02 * scale
        return w, b

    wqkv, bqkv, wf, bf, w1, b1, w2, b2, lng, lnb = ([] for _ in range(10))
    qscale = 1.0 / math.sqrt(DPH)                                  # folded into Q proj
    for li in range(LAYERS):
        ks = jax.random.split(lkeys[li], 6)
        wq, bq = dense(ks[0], D, D, qscale)
        wk, bk = dense(ks[1], D, D)
        wv, bv = dense(ks[2], D, D)
        wqkv.append(jnp.concatenate([wq, wk, wv], axis=1))
        bqkv.append(jnp.concatenate([bq, bk, bv], axis=1))
        w, b = dense(ks[3], D, D); wf.append(w); bf.append(b)
        w, b = dense(ks[4], D, FFN); w1.append(w); b1.append(b)
        w, b = dense(ks[5], FFN, D); w2.append(w); b2.append(b)
        lng.append(jnp.ones((1, D), jnp.float32))
        lnb.append(jnp.zeros((1, D), jnp.float32))

    stacked = dict(wqkv=jnp.stack(wqkv), bqkv=jnp.stack(bqkv),
                   wf=jnp.stack(wf), bf=jnp.stack(bf),
                   w1=jnp.stack(w1), b1=jnp.stack(b1),
                   w2=jnp.stack(w2), b2=jnp.stack(b2),
                   ln_g=jnp.stack(lng), ln_b=jnp.stack(lnb))
    return dict(embedding=jax.random.normal(k_emb, (VOCAB, D), jnp.float32) * 0.02,
                pe=make_positional_encoding(MAX_LEN, D),
                perm=make_head_permutation(),
                mask=make_head_mask(),
                stacked=stacked)


# ----------------------- main -----------------------

if __name__ == "__main__":
    key = jax.random.PRNGKey(0)
    kp, ki = jax.random.split(key)

    params = init_params(kp)
    inputs = jax.random.randint(ki, (B, T), 1, VOCAB, dtype=jnp.int32)   # token ids
    inputs_len = jnp.full((B,), T, dtype=jnp.int32)

    fwd = jax.jit(encoder_forward)
    outputs, attentions = fwd(params, inputs, inputs_len)

    jax.block_until_ready(outputs)
    for a in attentions:
        jax.block_until_ready(a)

    assert outputs.shape == (B, T, D)
    assert len(attentions) == LAYERS
    assert attentions[0].shape == (B * H, T, T)
    assert bool(jnp.all(jnp.isfinite(outputs)))
    # softmax rows sum to ~1 (approx reciprocal -> loose tolerance)
    assert bool(jnp.allclose(jnp.sum(attentions[0], axis=-1), 1.0, atol=1e-2))
    print("KERNEL_OK")
</pallas_src>

<mosaic_0001>
module attributes {stable_mosaic.version = 11 : i64} {
  func.func @_encoder_stack_kernel(%arg0: i32, %arg1: memref<16x128xf32, #tpu.memory_space<vmem>>, %arg2: memref<64x64xf32, #tpu.memory_space<vmem>>, %arg3: memref<64x64xf32, #tpu.memory_space<vmem>>, %arg4: memref<1x128x384xf32, #tpu.memory_space<vmem>>, %arg5: memref<1x1x384xf32, #tpu.memory_space<vmem>>, %arg6: memref<1x128x128xf32, #tpu.memory_space<vmem>>, %arg7: memref<1x1x128xf32, #tpu.memory_space<vmem>>, %arg8: memref<1x128x256xf32, #tpu.memory_space<vmem>>, %arg9: memref<1x1x256xf32, #tpu.memory_space<vmem>>, %arg10: memref<1x256x128xf32, #tpu.memory_space<vmem>>, %arg11: memref<1x1x128xf32, #tpu.memory_space<vmem>>, %arg12: memref<1x1x128xf32, #tpu.memory_space<vmem>>, %arg13: memref<1x1x128xf32, #tpu.memory_space<vmem>>, %arg14: memref<16x128xf32, #tpu.memory_space<vmem>>, %arg15: memref<1x8x8x8xf32, #tpu.memory_space<vmem>>, %arg16: memref<16x128xf32, #tpu.memory_space<vmem>>) attributes {dimension_semantics = [#tpu.dimension_semantics<arbitrary>], iteration_bounds = array<i64: 2>, scalar_prefetch = 0 : i64, scratch_operands = 1 : i64, tpu.core_type = #tpu.core_type<tc>, window_params = [{pipeline_mode = #tpu.pipeline_mode<synchronous>, transform_indices = @transform_0, window_bounds = array<i64: 16, 128>}, {pipeline_mode = #tpu.pipeline_mode<synchronous>, transform_indices = @transform_1, window_bounds = array<i64: 64, 64>}, {pipeline_mode = #tpu.pipeline_mode<synchronous>, transform_indices = @transform_2, window_bounds = array<i64: 64, 64>}, {transform_indices = @transform_3, window_bounds = array<i64: 1, 128, 384>}, {transform_indices = @transform_4, window_bounds = array<i64: 1, 1, 384>}, {transform_indices = @transform_5, window_bounds = array<i64: 1, 128, 128>}, {transform_indices = @transform_6, window_bounds = array<i64: 1, 1, 128>}, {transform_indices = @transform_7, window_bounds = array<i64: 1, 128, 256>}, {transform_indices = @transform_8, window_bounds = array<i64: 1, 1, 256>}, {transform_indices = @transform_9, window_bounds = array<i64: 1, 256, 128>}, {transform_indices = @transform_10, window_bounds = array<i64: 1, 1, 128>}, {transform_indices = @transform_11, window_bounds = array<i64: 1, 1, 128>}, {transform_indices = @transform_12, window_bounds = array<i64: 1, 1, 128>}, {pipeline_mode = #tpu.pipeline_mode<synchronous>, transform_indices = @transform_13, window_bounds = array<i64: 16, 128>}, {transform_indices = @transform_14, window_bounds = array<i64: 1, 8, 8, 8>}]} {
    %c0_i32 = arith.constant 0 : i32
    %0 = arith.cmpi eq, %arg0, %c0_i32 : i32
    %1 = arith.extui %0 : i1 to i32
    %c0_i32_0 = arith.constant 0 : i32
    %2 = arith.cmpi ne, %1, %c0_i32_0 : i32
    scf.if %2 {
      %c0_82 = arith.constant 0 : index
      %c0_83 = arith.constant 0 : index
      %140 = vector.load %arg1[%c0_82, %c0_83] : memref<16x128xf32, #tpu.memory_space<vmem>>, vector<16x128xf32>
      %c0_84 = arith.constant 0 : index
      %c0_85 = arith.constant 0 : index
      %141 = vector.load %arg16[%c0_84, %c0_85] : memref<16x128xf32, #tpu.memory_space<vmem>>, vector<16x128xf32>
      tpu.vector_store %arg16[%c0_84, %c0_85], %140 {strides = array<i32>} : memref<16x128xf32, #tpu.memory_space<vmem>>, vector<16x128xf32>,
    } else {
    }
    %c0 = arith.constant 0 : index
    %c0_1 = arith.constant 0 : index
    %3 = vector.load %arg16[%c0, %c0_1] : memref<16x128xf32, #tpu.memory_space<vmem>>, vector<16x128xf32>
    %c0_2 = arith.constant 0 : index
    %c0_3 = arith.constant 0 : index
    %c0_4 = arith.constant 0 : index
    %4 = vector.load %arg4[%c0_2, %c0_3, %c0_4] : memref<1x128x384xf32, #tpu.memory_space<vmem>>, vector<1x128x384xf32>
    %5 = vector.shape_cast %4 : vector<1x128x384xf32> to vector<128x384xf32>
    %cst = arith.constant dense<0.000000e+00> : vector<16x384xf32>
    %6 = tpu.matmul %3, %5, %cst {dimension_numbers = #tpu.dot_dimension_numbers<[1], [0], [0], [1], [0, 0, 1, 1], [], []>} : vector<16x128xf32>, vector<128x384xf32>, vector<16x384xf32> -> vector<16x384xf32>
    %c0_5 = arith.constant 0 : index
    %c0_6 = arith.constant 0 : index
    %c0_7 = arith.constant 0 : index
    %7 = vector.load %arg5[%c0_5, %c0_6, %c0_7] : memref<1x1x384xf32, #tpu.memory_space<vmem>>, vector<1x1x384xf32>
    %8 = vector.shape_cast %7 : vector<1x1x384xf32> to vector<1x384xf32>
    %9 = vector.broadcast %8 : vector<1x384xf32> to vector<16x384xf32>
    %10 = arith.addf %6, %9 : vector<16x384xf32>
    %11 = vector.extract_strided_slice %10 {offsets = [0, 0], sizes = [16, 128], strides = [1, 1]} : vector<16x384xf32> to vector<16x128xf32>
    %12 = vector.extract_strided_slice %10 {offsets = [0, 128], sizes = [16, 128], strides = [1, 1]} : vector<16x384xf32> to vector<16x128xf32>
    %13 = vector.extract_strided_slice %10 {offsets = [0, 256], sizes = [16, 128], strides = [1, 1]} : vector<16x384xf32> to vector<16x128xf32>
    %c0_8 = arith.constant 0 : index
    %c0_9 = arith.constant 0 : index
    %14 = vector.load %arg2[%c0_8, %c0_9] : memref<64x64xf32, #tpu.memory_space<vmem>>, vector<64x64xf32>
    %15 = vector.extract_strided_slice %11 {offsets = [0, 0], sizes = [16, 32], strides = [1, 1]} : vector<16x128xf32> to vector<16x32xf32>
    %16 = vector.extract_strided_slice %11 {offsets = [0, 32], sizes = [16, 32], strides = [1, 1]} : vector<16x128xf32> to vector<16x32xf32>
    %17 = vector.extract_strided_slice %11 {offsets = [0, 64], sizes = [16, 32], strides = [1, 1]} : vector<16x128xf32> to vector<16x32xf32>
    %18 = vector.extract_strided_slice %11 {offsets = [0, 96], sizes = [16, 32], strides = [1, 1]} : vector<16x128xf32> to vector<16x32xf32>
    %19 = tpu.concatenate %15, %16, %17, %18 in 0 : vector<16x32xf32>, vector<16x32xf32>, vector<16x32xf32>, vector<16x32xf32> -> vector<64x32xf32>
    %cst_10 = arith.constant dense<0.000000e+00> : vector<64x32xf32>
    %20 = tpu.matmul %14, %19, %cst_10 {dimension_numbers = #tpu.dot_dimension_numbers<[1], [0], [0], [1], [0, 0, 1, 1], [], []>} : vector<64x64xf32>, vector<64x32xf32>, vector<64x32xf32> -> vector<64x32xf32>
    %21 = vector.extract_strided_slice %12 {offsets = [0, 0], sizes = [16, 32], strides = [1, 1]} : vector<16x128xf32> to vector<16x32xf32>
    %22 = vector.extract_strided_slice %12 {offsets = [0, 32], sizes = [16, 32], strides = [1, 1]} : vector<16x128xf32> to vector<16x32xf32>
    %23 = vector.extract_strided_slice %12 {offsets = [0, 64], sizes = [16, 32], strides = [1, 1]} : vector<16x128xf32> to vector<16x32xf32>
    %24 = vector.extract_strided_slice %12 {offsets = [0, 96], sizes = [16, 32], strides = [1, 1]} : vector<16x128xf32> to vector<16x32xf32>
    %25 = tpu.concatenate %21, %22, %23, %24 in 0 : vector<16x32xf32>, vector<16x32xf32>, vector<16x32xf32>, vector<16x32xf32> -> vector<64x32xf32>
    %cst_11 = arith.constant dense<0.000000e+00> : vector<64x32xf32>
    %26 = tpu.matmul %14, %25, %cst_11 {dimension_numbers = #tpu.dot_dimension_numbers<[1], [0], [0], [1], [0, 0, 1, 1], [], []>} : vector<64x64xf32>, vector<64x32xf32>, vector<64x32xf32> -> vector<64x32xf32>
    %27 = vector.extract_strided_slice %13 {offsets = [0, 0], sizes = [16, 32], strides = [1, 1]} : vector<16x128xf32> to vector<16x32xf32>
    %28 = vector.extract_strided_slice %13 {offsets = [0, 32], sizes = [16, 32], strides = [1, 1]} : vector<16x128xf32> to vector<16x32xf32>
    %29 = vector.extract_strided_slice %13 {offsets = [0, 64], sizes = [16, 32], strides = [1, 1]} : vector<16x128xf32> to vector<16x32xf32>
    %30 = vector.extract_strided_slice %13 {offsets = [0, 96], sizes = [16, 32], strides = [1, 1]} : vector<16x128xf32> to vector<16x32xf32>
    %31 = tpu.concatenate %27, %28, %29, %30 in 0 : vector<16x32xf32>, vector<16x32xf32>, vector<16x32xf32>, vector<16x32xf32> -> vector<64x32xf32>
    %cst_12 = arith.constant dense<0.000000e+00> : vector<64x32xf32>
    %32 = tpu.matmul %14, %31, %cst_12 {dimension_numbers = #tpu.dot_dimension_numbers<[1], [0], [0], [1], [0, 0, 1, 1], [], []>} : vector<64x64xf32>, vector<64x32xf32>, vector<64x32xf32> -> vector<64x32xf32>
    %cst_13 = arith.constant dense<0.000000e+00> : vector<64x64xf32>
    %33 = tpu.matmul %20, %26, %cst_13 {dimension_numbers = #tpu.dot_dimension_numbers<[1], [1], [0], [0], [0, 0, 1, 0], [], []>} : vector<64x32xf32>, vector<64x32xf32>, vector<64x64xf32> -> vector<64x64xf32>
    %c0_14 = arith.constant 0 : index
    %c0_15 = arith.constant 0 : index
    %34 = vector.load %arg3[%c0_14, %c0_15] : memref<64x64xf32, #tpu.memory_space<vmem>>, vector<64x64xf32>
    %35 = arith.addf %33, %34 : vector<64x64xf32>
    %cst_16 = arith.constant dense<0xFF800000> : vector<64xf32>
    %36 = vector.multi_reduction <maximumf>, %35, %cst_16 [1] : vector<64x64xf32> to vector<64xf32>
    %37 = vector.shape_cast %36 : vector<64xf32> to vector<64x1xf32>
    %38 = vector.broadcast %37 : vector<64x1xf32> to vector<64x64xf32>
    %39 = arith.subf %35, %38 : vector<64x64xf32>
    %40 = math.exp %39 : vector<64x64xf32>
    %cst_17 = arith.constant dense<0.000000e+00> : vector<64xf32>
    %41 = vector.multi_reduction <add>, %40, %cst_17 [1] : vector<64x64xf32> to vector<64xf32>
    %42 = vector.shape_cast %41 : vector<64xf32> to vector<64x1xf32>
    %43 = tpu.reciprocal %42 {approx = true} : vector<64x1xf32> -> vector<64x1xf32>
    %44 = vector.broadcast %43 : vector<64x1xf32> to vector<64x64xf32>
    %45 = arith.mulf %40, %44 : vector<64x64xf32>
    %46 = vector.extract_strided_slice %45 {offsets = [0, 0], sizes = [8, 8], strides = [1, 1]} : vector<64x64xf32> to vector<8x8xf32>
    %c0_18 = arith.constant 0 : index
    %c0_19 = arith.constant 0 : index
    %c0_20 = arith.constant 0 : index
    %c0_21 = arith.constant 0 : index
    %47 = vector.load %arg15[%c0_18, %c0_19, %c0_20, %c0_21] : memref<1x8x8x8xf32, #tpu.memory_space<vmem>>, vector<1x1x8x8xf32>
    %48 = vector.shape_cast %47 : vector<1x1x8x8xf32> to vector<8x8xf32>
    %49 = vector.shape_cast %46 : vector<8x8xf32> to vector<1x1x8x8xf32>
    tpu.vector_store %arg15[%c0_18, %c0_19, %c0_20, %c0_21], %49 {strides = array<i32>} : memref<1x8x8x8xf32, #tpu.memory_space<vmem>>, vector<1x1x8x8xf32>,
    %50 = vector.extract_strided_slice %45 {offsets = [8, 8], sizes = [8, 8], strides = [1, 1]} : vector<64x64xf32> to vector<8x8xf32>
    %c0_22 = arith.constant 0 : index
    %c1 = arith.constant 1 : index
    %c0_23 = arith.constant 0 : index
    %c0_24 = arith.constant 0 : index
    %51 = vector.load %arg15[%c0_22, %c1, %c0_23, %c0_24] : memref<1x8x8x8xf32, #tpu.memory_space<vmem>>, vector<1x1x8x8xf32>
    %52 = vector.shape_cast %51 : vector<1x1x8x8xf32> to vector<8x8xf32>
    %53 = vector.shape_cast %50 : vector<8x8xf32> to vector<1x1x8x8xf32>
    tpu.vector_store %arg15[%c0_22, %c1, %c0_23, %c0_24], %53 {strides = array<i32>} : memref<1x8x8x8xf32, #tpu.memory_space<vmem>>, vector<1x1x8x8xf32>,
    %54 = vector.extract_strided_slice %45 {offsets = [16, 16], sizes = [8, 8], strides = [1, 1]} : vector<64x64xf32> to vector<8x8xf32>
    %c0_25 = arith.constant 0 : index
    %c2 = arith.constant 2 : index
    %c0_26 = arith.constant 0 : index
    %c0_27 = arith.constant 0 : index
    %55 = vector.load %arg15[%c0_25, %c2, %c0_26, %c0_27] : memref<1x8x8x8xf32, #tpu.memory_space<vmem>>, vector<1x1x8x8xf32>
    %56 = vector.shape_cast %55 : vector<1x1x8x8xf32> to vector<8x8xf32>
    %57 = vector.shape_cast %54 : vector<8x8xf32> to vector<1x1x8x8xf32>
    tpu.vector_store %arg15[%c0_25, %c2, %c0_26, %c0_27], %57 {strides = array<i32>} : memref<1x8x8x8xf32, #tpu.memory_space<vmem>>, vector<1x1x8x8xf32>,
    %58 = vector.extract_strided_slice %45 {offsets = [24, 24], sizes = [8, 8], strides = [1, 1]} : vector<64x64xf32> to vector<8x8xf32>
    %c0_28 = arith.constant 0 : index
    %c3 = arith.constant 3 : index
    %c0_29 = arith.constant 0 : index
    %c0_30 = arith.constant 0 : index
    %59 = vector.load %arg15[%c0_28, %c3, %c0_29, %c0_30] : memref<1x8x8x8xf32, #tpu.memory_space<vmem>>, vector<1x1x8x8xf32>
    %60 = vector.shape_cast %59 : vector<1x1x8x8xf32> to vector<8x8xf32>
    %61 = vector.shape_cast %58 : vector<8x8xf32> to vector<1x1x8x8xf32>
    tpu.vector_store %arg15[%c0_28, %c3, %c0_29, %c0_30], %61 {strides = array<i32>} : memref<1x8x8x8xf32, #tpu.memory_space<vmem>>, vector<1x1x8x8xf32>,
    %62 = vector.extract_strided_slice %45 {offsets = [32, 32], sizes = [8, 8], strides = [1, 1]} : vector<64x64xf32> to vector<8x8xf32>
    %c0_31 = arith.constant 0 : index
    %c4 = arith.constant 4 : index
    %c0_32 = arith.constant 0 : index
    %c0_33 = arith.constant 0 : index
    %63 = vector.load %arg15[%c0_31, %c4, %c0_32, %c0_33] : memref<1x8x8x8xf32, #tpu.memory_space<vmem>>, vector<1x1x8x8xf32>
    %64 = vector.shape_cast %63 : vector<1x1x8x8xf32> to vector<8x8xf32>
    %65 = vector.shape_cast %62 : vector<8x8xf32> to vector<1x1x8x8xf32>
    tpu.vector_store %arg15[%c0_31, %c4, %c0_32, %c0_33], %65 {strides = array<i32>} : memref<1x8x8x8xf32, #tpu.memory_space<vmem>>, vector<1x1x8x8xf32>,
    %66 = vector.extract_strided_slice %45 {offsets = [40, 40], sizes = [8, 8], strides = [1, 1]} : vector<64x64xf32> to vector<8x8xf32>
    %c0_34 = arith.constant 0 : index
    %c5 = arith.constant 5 : index
    %c0_35 = arith.constant 0 : index
    %c0_36 = arith.constant 0 : index
    %67 = vector.load %arg15[%c0_34, %c5, %c0_35, %c0_36] : memref<1x8x8x8xf32, #tpu.memory_space<vmem>>, vector<1x1x8x8xf32>
    %68 = vector.shape_cast %67 : vector<1x1x8x8xf32> to vector<8x8xf32>
    %69 = vector.shape_cast %66 : vector<8x8xf32> to vector<1x1x8x8xf32>
    tpu.vector_store %arg15[%c0_34, %c5, %c0_35, %c0_36], %69 {strides = array<i32>} : memref<1x8x8x8xf32, #tpu.memory_space<vmem>>, vector<1x1x8x8xf32>,
    %70 = vector.extract_strided_slice %45 {offsets = [48, 48], sizes = [8, 8], strides = [1, 1]} : vector<64x64xf32> to vector<8x8xf32>
    %c0_37 = arith.constant 0 : index
    %c6 = arith.constant 6 : index
    %c0_38 = arith.constant 0 : index
    %c0_39 = arith.constant 0 : index
    %71 = vector.load %arg15[%c0_37, %c6, %c0_38, %c0_39] : memref<1x8x8x8xf32, #tpu.memory_space<vmem>>, vector<1x1x8x8xf32>
    %72 = vector.shape_cast %71 : vector<1x1x8x8xf32> to vector<8x8xf32>
    %73 = vector.shape_cast %70 : vector<8x8xf32> to vector<1x1x8x8xf32>
    tpu.vector_store %arg15[%c0_37, %c6, %c0_38, %c0_39], %73 {strides = array<i32>} : memref<1x8x8x8xf32, #tpu.memory_space<vmem>>, vector<1x1x8x8xf32>,
    %74 = vector.extract_strided_slice %45 {offsets = [56, 56], sizes = [8, 8], strides = [1, 1]} : vector<64x64xf32> to vector<8x8xf32>
    %c0_40 = arith.constant 0 : index
    %c7 = arith.constant 7 : index
    %c0_41 = arith.constant 0 : index
    %c0_42 = arith.constant 0 : index
    %75 = vector.load %arg15[%c0_40, %c7, %c0_41, %c0_42] : memref<1x8x8x8xf32, #tpu.memory_space<vmem>>, vector<1x1x8x8xf32>
    %76 = vector.shape_cast %75 : vector<1x1x8x8xf32> to vector<8x8xf32>
    %77 = vector.shape_cast %74 : vector<8x8xf32> to vector<1x1x8x8xf32>
    tpu.vector_store %arg15[%c0_40, %c7, %c0_41, %c0_42], %77 {strides = array<i32>} : memref<1x8x8x8xf32, #tpu.memory_space<vmem>>, vector<1x1x8x8xf32>,
    %cst_43 = arith.constant dense<0.000000e+00> : vector<64x32xf32>
    %78 = tpu.matmul %45, %32, %cst_43 {dimension_numbers = #tpu.dot_dimension_numbers<[1], [0], [0], [1], [0, 0, 1, 1], [], []>} : vector<64x64xf32>, vector<64x32xf32>, vector<64x32xf32> -> vector<64x32xf32>
    %cst_44 = arith.constant dense<0.000000e+00> : vector<64x32xf32>
    %79 = tpu.matmul %14, %78, %cst_44 {dimension_numbers = #tpu.dot_dimension_numbers<[0], [0], [1], [1], [0, 1, 1, 1], [], []>} : vector<64x64xf32>, vector<64x32xf32>, vector<64x32xf32> -> vector<64x32xf32>
    %80 = vector.extract_strided_slice %79 {offsets = [0, 0], sizes = [16, 32], strides = [1, 1]} : vector<64x32xf32> to vector<16x32xf32>
    %81 = vector.extract_strided_slice %79 {offsets = [16, 0], sizes = [16, 32], strides = [1, 1]} : vector<64x32xf32> to vector<16x32xf32>
    %82 = vector.extract_strided_slice %79 {offsets = [32, 0], sizes = [16, 32], strides = [1, 1]} : vector<64x32xf32> to vector<16x32xf32>
    %83 = vector.extract_strided_slice %79 {offsets = [48, 0], sizes = [16, 32], strides = [1, 1]} : vector<64x32xf32> to vector<16x32xf32>
    %84 = tpu.concatenate %80, %81, %82, %83 in 1 : vector<16x32xf32>, vector<16x32xf32>, vector<16x32xf32>, vector<16x32xf32> -> vector<16x128xf32>
    %c0_45 = arith.constant 0 : index
    %c0_46 = arith.constant 0 : index
    %c0_47 = arith.constant 0 : index
    %85 = vector.load %arg6[%c0_45, %c0_46, %c0_47] : memref<1x128x128xf32, #tpu.memory_space<vmem>>, vector<1x128x128xf32>
    %86 = vector.shape_cast %85 : vector<1x128x128xf32> to vector<128x128xf32>
    %cst_48 = arith.constant dense<0.000000e+00> : vector<16x128xf32>
    %87 = tpu.matmul %84, %86, %cst_48 {dimension_numbers = #tpu.dot_dimension_numbers<[1], [0], [0], [1], [0, 0, 1, 1], [], []>} : vector<16x128xf32>, vector<128x128xf32>, vector<16x128xf32> -> vector<16x128xf32>
    %c0_49 = arith.constant 0 : index
    %c0_50 = arith.constant 0 : index
    %c0_51 = arith.constant 0 : index
    %88 = vector.load %arg7[%c0_49, %c0_50, %c0_51] : memref<1x1x128xf32, #tpu.memory_space<vmem>>, vector<1x1x128xf32>
    %89 = vector.shape_cast %88 : vector<1x1x128xf32> to vector<1x128xf32>
    %90 = vector.broadcast %89 : vector<1x128xf32> to vector<16x128xf32>
    %91 = arith.addf %87, %90 : vector<16x128xf32>
    %92 = arith.addf %91, %3 : vector<16x128xf32>
    %c0_52 = arith.constant 0 : index
    %c0_53 = arith.constant 0 : index
    %c0_54 = arith.constant 0 : index
    %93 = vector.load %arg8[%c0_52, %c0_53, %c0_54] : memref<1x128x256xf32, #tpu.memory_space<vmem>>, vector<1x128x256xf32>
    %94 = vector.shape_cast %93 : vector<1x128x256xf32> to vector<128x256xf32>
    %cst_55 = arith.constant dense<0.000000e+00> : vector<16x256xf32>
    %95 = tpu.matmul %92, %94, %cst_55 {dimension_numbers = #tpu.dot_dimension_numbers<[1], [0], [0], [1], [0, 0, 1, 1], [], []>} : vector<16x128xf32>, vector<128x256xf32>, vector<16x256xf32> -> vector<16x256xf32>
    %c0_56 = arith.constant 0 : index
    %c0_57 = arith.constant 0 : index
    %c0_58 = arith.constant 0 : index
    %96 = vector.load %arg9[%c0_56, %c0_57, %c0_58] : memref<1x1x256xf32, #tpu.memory_space<vmem>>, vector<1x1x256xf32>
    %97 = vector.shape_cast %96 : vector<1x1x256xf32> to vector<1x256xf32>
    %98 = vector.broadcast %97 : vector<1x256xf32> to vector<16x256xf32>
    %99 = arith.addf %95, %98 : vector<16x256xf32>
    %cst_59 = arith.constant 0.000000e+00 : f32
    %100 = vector.broadcast %cst_59 : f32 to vector<16x256xf32>
    %101 = arith.maximumf %99, %100 : vector<16x256xf32>
    %c0_60 = arith.constant 0 : index
    %c0_61 = arith.constant 0 : index
    %c0_62 = arith.constant 0 : index
    %102 = vector.load %arg10[%c0_60, %c0_61, %c0_62] : memref<1x256x128xf32, #tpu.memory_space<vmem>>, vector<1x256x128xf32>
    %103 = vector.shape_cast %102 : vector<1x256x128xf32> to vector<256x128xf32>
    %cst_63 = arith.constant dense<0.000000e+00> : vector<16x128xf32>
    %104 = tpu.matmul %101, %103, %cst_63 {dimension_numbers = #tpu.dot_dimension_numbers<[1], [0], [0], [1], [0, 0, 1, 1], [], []>} : vector<16x256xf32>, vector<256x128xf32>, vector<16x128xf32> -> vector<16x128xf32>
    %c0_64 = arith.constant 0 : index
    %c0_65 = arith.constant 0 : index
    %c0_66 = arith.constant 0 : index
    %105 = vector.load %arg11[%c0_64, %c0_65, %c0_66] : memref<1x1x128xf32, #tpu.memory_space<vmem>>, vector<1x1x128xf32>
    %106 = vector.shape_cast %105 : vector<1x1x128xf32> to vector<1x128xf32>
    %107 = vector.broadcast %106 : vector<1x128xf32> to vector<16x128xf32>
    %108 = arith.addf %104, %107 : vector<16x128xf32>
    %109 = arith.addf %108, %92 : vector<16x128xf32>
    %cst_67 = arith.constant dense<0.000000e+00> : vector<16xf32>
    %110 = vector.multi_reduction <add>, %109, %cst_67 [1] : vector<16x128xf32> to vector<16xf32>
    %111 = vector.shape_cast %110 : vector<16xf32> to vector<16x1xf32>
    %cst_68 = arith.constant 1.280000e+02 : f32
    %112 = vector.broadcast %cst_68 : f32 to vector<16x1xf32>
    %113 = arith.divf %111, %112 : vector<16x1xf32>
    %114 = vector.broadcast %113 : vector<16x1xf32> to vector<16x128xf32>
    %115 = arith.subf %109, %114 : vector<16x128xf32>
    %116 = vector.broadcast %113 : vector<16x1xf32> to vector<16x128xf32>
    %117 = arith.subf %109, %116 : vector<16x128xf32>
    %118 = arith.mulf %115, %117 : vector<16x128xf32>
    %cst_69 = arith.constant dense<0.000000e+00> : vector<16xf32>
    %119 = vector.multi_reduction <add>, %118, %cst_69 [1] : vector<16x128xf32> to vector<16xf32>
    %120 = vector.shape_cast %119 : vector<16xf32> to vector<16x1xf32>
    %cst_70 = arith.constant 1.280000e+02 : f32
    %121 = vector.broadcast %cst_70 : f32 to vector<16x1xf32>
    %122 = arith.divf %120, %121 : vector<16x1xf32>
    %123 = vector.broadcast %113 : vector<16x1xf32> to vector<16x128xf32>
    %124 = arith.subf %109, %123 : vector<16x128xf32>
    %cst_71 = arith.constant 9.99999974E-6 : f32
    %125 = vector.broadcast %cst_71 : f32 to vector<16x1xf32>
    %126 = arith.addf %122, %125 : vector<16x1xf32>
    %127 = math.rsqrt %126 : vector<16x1xf32>
    %128 = vector.broadcast %127 : vector<16x1xf32> to vector<16x128xf32>
    %129 = arith.mulf %124, %128 : vector<16x128xf32>
    %c0_72 = arith.constant 0 : index
    %c0_73 = arith.constant 0 : index
    %c0_74 = arith.constant 0 : index
    %130 = vector.load %arg12[%c0_72, %c0_73, %c0_74] : memref<1x1x128xf32, #tpu.memory_space<vmem>>, vector<1x1x128xf32>
    %131 = vector.shape_cast %130 : vector<1x1x128xf32> to vector<1x128xf32>
    %132 = vector.broadcast %131 : vector<1x128xf32> to vector<16x128xf32>
    %133 = arith.mulf %129, %132 : vector<16x128xf32>
    %c0_75 = arith.constant 0 : index
    %c0_76 = arith.constant 0 : index
    %c0_77 = arith.constant 0 : index
    %134 = vector.load %arg13[%c0_75, %c0_76, %c0_77] : memref<1x1x128xf32, #tpu.memory_space<vmem>>, vector<1x1x128xf32>
    %135 = vector.shape_cast %134 : vector<1x1x128xf32> to vector<1x128xf32>
    %136 = vector.broadcast %135 : vector<1x128xf32> to vector<16x128xf32>
    %137 = arith.addf %133, %136 : vector<16x128xf32>
    %c0_78 = arith.constant 0 : index
    %c0_79 = arith.constant 0 : index
    %138 = vector.load %arg16[%c0_78, %c0_79] : memref<16x128xf32, #tpu.memory_space<vmem>>, vector<16x128xf32>
    tpu.vector_store %arg16[%c0_78, %c0_79], %137 {strides = array<i32>} : memref<16x128xf32, #tpu.memory_space<vmem>>, vector<16x128xf32>,
    %c0_80 = arith.constant 0 : index
    %c0_81 = arith.constant 0 : index
    %139 = vector.load %arg14[%c0_80, %c0_81] : memref<16x128xf32, #tpu.memory_space<vmem>>, vector<16x128xf32>
    tpu.vector_store %arg14[%c0_80, %c0_81], %137 {strides = array<i32>} : memref<16x128xf32, #tpu.memory_space<vmem>>, vector<16x128xf32>,
    return
  }
  func.func @transform_0(%arg0: i32) -> (i32, i32) {
    %c0_i32 = arith.constant 0 : i32
    %c0_i32_0 = arith.constant 0 : i32
    %c0_i32_1 = arith.constant 0 : i32
    return %c0_i32, %c0_i32_0 : i32, i32
  }
  func.func @transform_1(%arg0: i32) -> (i32, i32) {
    %c0_i32 = arith.constant 0 : i32
    %c0_i32_0 = arith.constant 0 : i32
    %c0_i32_1 = arith.constant 0 : i32
    return %c0_i32, %c0_i32_0 : i32, i32
  }
  func.func @transform_2(%arg0: i32) -> (i32, i32) {
    %c0_i32 = arith.constant 0 : i32
    %c0_i32_0 = arith.constant 0 : i32
    %c0_i32_1 = arith.constant 0 : i32
    return %c0_i32, %c0_i32_0 : i32, i32
  }
  func.func @transform_3(%arg0: i32) -> (i32, i32, i32) {
    %c0_i32 = arith.constant 0 : i32
    %c0_i32_0 = arith.constant 0 : i32
    %c0_i32_1 = arith.constant 0 : i32
    return %arg0, %c0_i32, %c0_i32_0 : i32, i32, i32
  }
  func.func @transform_4(%arg0: i32) -> (i32, i32, i32) {
    %c0_i32 = arith.constant 0 : i32
    %c0_i32_0 = arith.constant 0 : i32
    %c0_i32_1 = arith.constant 0 : i32
    return %arg0, %c0_i32, %c0_i32_0 : i32, i32, i32
  }
  func.func @transform_5(%arg0: i32) -> (i32, i32, i32) {
    %c0_i32 = arith.constant 0 : i32
    %c0_i32_0 = arith.constant 0 : i32
    %c0_i32_1 = arith.constant 0 : i32
    return %arg0, %c0_i32, %c0_i32_0 : i32, i32, i32
  }
  func.func @transform_6(%arg0: i32) -> (i32, i32, i32) {
    %c0_i32 = arith.constant 0 : i32
    %c0_i32_0 = arith.constant 0 : i32
    %c0_i32_1 = arith.constant 0 : i32
    return %arg0, %c0_i32, %c0_i32_0 : i32, i32, i32
  }
  func.func @transform_7(%arg0: i32) -> (i32, i32, i32) {
    %c0_i32 = arith.constant 0 : i32
    %c0_i32_0 = arith.constant 0 : i32
    %c0_i32_1 = arith.constant 0 : i32
    return %arg0, %c0_i32, %c0_i32_0 : i32, i32, i32
  }
  func.func @transform_8(%arg0: i32) -> (i32, i32, i32) {
    %c0_i32 = arith.constant 0 : i32
    %c0_i32_0 = arith.constant 0 : i32
    %c0_i32_1 = arith.constant 0 : i32
    return %arg0, %c0_i32, %c0_i32_0 : i32, i32, i32
  }
  func.func @transform_9(%arg0: i32) -> (i32, i32, i32) {
    %c0_i32 = arith.constant 0 : i32
    %c0_i32_0 = arith.constant 0 : i32
    %c0_i32_1 = arith.constant 0 : i32
    return %arg0, %c0_i32, %c0_i32_0 : i32, i32, i32
  }
  func.func @transform_10(%arg0: i32) -> (i32, i32, i32) {
    %c0_i32 = arith.constant 0 : i32
    %c0_i32_0 = arith.constant 0 : i32
    %c0_i32_1 = arith.constant 0 : i32
    return %arg0, %c0_i32, %c0_i32_0 : i32, i32, i32
  }
  func.func @transform_11(%arg0: i32) -> (i32, i32, i32) {
    %c0_i32 = arith.constant 0 : i32
    %c0_i32_0 = arith.constant 0 : i32
    %c0_i32_1 = arith.constant 0 : i32
    return %arg0, %c0_i32, %c0_i32_0 : i32, i32, i32
  }
  func.func @transform_12(%arg0: i32) -> (i32, i32, i32) {
    %c0_i32 = arith.constant 0 : i32
    %c0_i32_0 = arith.constant 0 : i32
    %c0_i32_1 = arith.constant 0 : i32
    return %arg0, %c0_i32, %c0_i32_0 : i32, i32, i32
  }
  func.func @transform_13(%arg0: i32) -> (i32, i32) {
    %c0_i32 = arith.constant 0 : i32
    %c0_i32_0 = arith.constant 0 : i32
    %c0_i32_1 = arith.constant 0 : i32
    return %c0_i32, %c0_i32_0 : i32, i32
  }
  func.func @transform_14(%arg0: i32) -> (i32, i32, i32, i32) {
    %c0_i32 = arith.constant 0 : i32
    %c0_i32_0 = arith.constant 0 : i32
    %c0_i32_1 = arith.constant 0 : i32
    %c0_i32_2 = arith.constant 0 : i32
    return %arg0, %c0_i32, %c0_i32_0, %c0_i32_1 : i32, i32, i32, i32
  }
}

</mosaic_0001>

<bundles_post_ra>
// kernel: encoder_forward.1
= control target key start
LH: loop header
LB: loop body
LE: loop exit
PB: predicated region body
PF: predicated region fallthrough
CT: control target
= control target key end

     0   :  { %s4651_s0 = inlined_call_operand.vmem [shape: f32[16,128], index: 0, kind: input, shape index: {}]   ;;  %s4652_s1 = inlined_call_operand.hbm [shape: f32[64,64], index: 1, kind: input, shape index: {}]   ;;  %s4653_s2 = inlined_call_operand.hbm [shape: f32[64,64], index: 2, kind: input, shape index: {}]   ;;  %s4654_s3 = inlined_call_operand.hbm [shape: f32[2,128,384], index: 3, kind: input, shape index: {}]   ;;  %s4655_s4 = inlined_call_operand.vmem [shape: f32[2,1,384], index: 4, kind: input, shape index: {}]   ;;  %s4656_s5 = inlined_call_operand.vmem [shape: f32[2,128,128], index: 5, kind: input, shape index: {}]   ;;  %s4657_s6 = inlined_call_operand.vmem [shape: f32[2,1,128], index: 6, kind: input, shape index: {}]   ;;  %s4658_s7 = inlined_call_operand.hbm [shape: f32[2,128,256], index: 7, kind: input, shape index: {}]   ;;  %s4659_s8 = inlined_call_operand.vmem [shape: f32[2,1,256], index: 8, kind: input, shape index: {}]   ;;  %s4660_s9 = inlined_call_operand.hbm [shape: f32[2,256,128], index: 9, kind: input, shape index: {}]   ;;  %s4661_s10 = inlined_call_operand.vmem [shape: f32[2,1,128], index: 10, kind: input, shape index: {}]   ;;  %s4662_s11 = inlined_call_operand.vmem [shape: f32[2,1,128], index: 11, kind: input, shape index: {}]   ;;  %s4663_s12 = inlined_call_operand.hbm [shape: f32[2,1,128], index: 12, kind: input, shape index: {}]   ;;  %s4664_s13 = inlined_call_operand.hbm [shape: f32[16,128], index: 13, kind: output, shape index: {0}]   ;;  %s4665_s14 = inlined_call_operand.vmem [shape: f32[2,8,8,8], index: 14, kind: output, shape index: {1}]  }
   0x1   :  { %4685 = sst [smem:[#allocation20_spill]] %s4651_s0 }
   0x2   :  { %4686 = sst [smem:[#allocation21_spill]] %s4652_s1 }
   0x3   :  { %4687 = sst [smem:[#allocation22_spill]] %s4653_s2 }
   0x4   :  { %4688 = sst [smem:[#allocation23_spill]] %s4654_s3 }
   0x5   :  { %4689 = sst [smem:[#allocation24_spill]] %s4655_s4 }
   0x6   :  { %4690 = sst [smem:[#allocation25_spill]] %s4656_s5 }
   0x7   :  { %4691 = sst [smem:[#allocation26_spill]] %s4658_s7 }
   0x8   :  { %4692 = sst [smem:[#allocation27_spill]] %s4659_s8 }
   0x9   :  { %4693 = sst [smem:[#allocation28_spill]] %s4661_s10 }
   0xa   :  { %4694 = sst [smem:[#allocation29_spill]] %s4662_s11 }
   0xb   :  { %4695 = sst [smem:[#allocation30_spill]] %s4664_s13 }
   0xc   :  { %4696 = sst [smem:[#allocation31_spill]] %s4665_s14 }
   0xd   :  { %20 = vsyncpa [#allocation4], 0 }
   0xe   :  { %21 = vsyncpa [#allocation7], 0 }
   0xf   :  { %22 = vsyncpa [#allocation5], 0  ;;  %s3899_s29 = smov 0   ;;  %s3901_s30 = smov 0  }
  0x10   :  { %s3903_s15 = smov 0   ;;  %s3905_s16 = smov 0  }
  0x11 LB: > { %4697 = sst [smem:[#allocation17_spill]] %s3793_s15  ;;  %s3918_s17 = sadd.s32 4294967295, %s3797_s16   ;;  %s3797_s16 = sphi %s3905_s16, %s4740_s16   ;;  %s3793_s15 = sphi %s3903_s15, %s4742_s15   ;;  %s3789_s30 = sphi %s3901_s30, %s4744_s30   ;;  %s3785_s29 = sphi %s3899_s29, %s4743_s29  }
  0x12   : > { %s3921_s18 = sadd.s32 1, %s3797_s16   ;;  %s98_s20 = sadd.s32 1, %s3793_s15 }
  0x13   : > { %4698 = sst [smem:[#allocation18_spill]] %s3921_s18  ;;  %s95_s19 = ssub.s32 %s3797_s16, %s3921_s18 }
  0x14   : > { %p96_p0 = scmp.eq.s32.totalorder %s95_s19, 0  ;;  %p105_p1 = scmp.ne.s32.totalorder %s3793_s15, %s3789_s30 }
  0x15   : > { %p106_p2 = scmp.eq.s32.totalorder %s3797_s16, 0  ;;  %p111_p3 = scmp.ne.s32.totalorder %s3789_s30, %s3785_s29 }
  0x16   : > { %s3931_s21 = scalar_select %p96_p0, %s3793_s15, %s98_s20  }
  0x17   : > { %p3933_p4 = por %p106_p2, %p105_p1  ;;  %p4670_p5 = scmp.eq.s32.totalorder %s3918_s17, 0 }
  0x18   : > { %4699 = sst [smem:[#allocation19_spill]] %s3931_s21  ;;  %p2577_p6 = scmp.ge.s32.totalorder %s3797_s16, 1 }
  0x19   : > { %p403_p7 = scmp.lt.s32.totalorder %s3797_s16, 3  ;;  %p3942_p8 = por %p4670_p5, %p111_p3 }
  0x1a   : > { %s3799_s25 = smov [#allocation3]   ;;  %p3393_p13 = scmp.lt.s32.totalorder %s3797_s16, 2 }
  0x1b   : > { %s4701_s23 = scalar_select %p3942_p8, 1, 0 }
  0x1c   : > { %p3947_p10 = pnand %p2577_p6, %p403_p7  ;;  %s418_s26 = sshll.u32 %s3799_s25, 4  ;;  %s419_s26 = int_to_ptr.vmem [resolvable:$true] %s418_s26 }
  0x1d   : > { %s3962_s29 = sand.u32 1, %s3793_s15   ;;  %p3966_p0 = pnand %p3393_p13, %p3933_p4 }
  0x1e   : > { %s4702_s24 = scalar_select %p3947_p10, 1, 0 }
  0x1f   : > { %p3371_p11 = pneg %p3947_p10  ;;  %s4705_s1 = sld [smem:[#allocation21_spill]] }
  0x20   : > { %s4704_s19 = scalar_select %p3966_p0, 1, 0 }
  0x21   : > { %p3955_p12 = pnand %p3371_p11, %p4670_p5 }
  0x23   : > { %s4703_s27 = scalar_select %p3955_p12, 1, 0 }
  0x24   : > { %p4675_p2 = pneg %p3955_p12 }
  0x25   : > { %s3549_s21 = scalar_lea.hbm %s4705_s1, 1024 }
  0x26   : > { %p3550_p1 = scmp.ne.s32.totalorder %s4705_s1, %s3549_s21  ;;  %p3556_p4 = scmp.lt.u32.totalorder %s3549_s21, %s4705_s1 }
  0x28   : > { %p3552_p3 = pnand %p4675_p2, %p3550_p1 }
  0x2a   : > { %p3553_p6 = pneg %p3552_p3 }
  0x2c   : > { %p3558_p7 = pnand %p3556_p4, %p3553_p6 }
  0x2e   : > { %3561 = shalt.err (!%p3558_p7)
}
  0x2f   : > { %s3562_s15 = scalar_lea.vmem %s419_s26, 1024  ;;  %p3570_p5 = scmp.lt.s32.totalorder %s419_s26, %s419_s26 }
  0x30   : > { %p3563_p11 = scmp.ne.s32.totalorder %s419_s26, %s3562_s15  ;;  %p3571_p8 = scmp.lt.s32.totalorder %s3562_s15, %s3562_s15 }
  0x32   : > { %p3565_p13 = pnand %p3563_p11, %p4675_p2  ;;  %p3572_p10 = por %p3571_p8, %p3570_p5 }
  0x34   : > { %p3566_p9 = pneg %p3565_p13 }
  0x36   : > { %p3573_p0 = pnand %p3572_p10, %p3566_p9 }
  0x38   : > { %3576 = shalt.err (!%p3573_p0)
}
  0x39   : > { %s4678_s13 = smov 128   ;;  %s4680_s18 = smov 8  }
  0x3a   : > { %3374 = dma.hbm_to_vmem [thread:$0]  (!%p3955_p12), %s4705_s1, 1024, %s419_s26, [#allocation4], %s4678_s13, %s4678_s13, %s4680_s18  }
  0x3b   : > { %s3347_s15 = smul.u32 384, %s3962_s29  ;;  %s2582_s25 = sshll.u32 %s3962_s29, 8 }
  0x3c   : > { %s3348_s20 = smul.u32 6144, %s3797_s16  ;;  %s4706_s3 = sld [smem:[#allocation23_spill]] }
  0x3d   : > { %s449_s11 = scalar_lea.vmem [#allocation8], %s3347_s15  ;;  %s4707_s8 = sand.u32 1, %s3797_s16  }
  0x3e   : > { %s456_s10 = sshll.u32 %s449_s11, 4  ;;  %s4007_s4 = scalar_lea.sflag [#allocation4], %s4707_s8  ;;  %s4003_s10 = int_to_ptr.vmem [resolvable:$true] %s456_s10 }
  0x3f   : > { %p4708_p8 = scmp.ne.s32.totalorder %s4704_s19, 0 }
  0x41   : > { %p4013_p9 = pneg %p4708_p8 }
  0x42   : > { %s4001_s14 = scalar_lea.hbm %s4706_s3, %s3348_s20  ;;  %s3582_s11 = scalar_lea.hbm %s4706_s3, 12288 }
  0x43   : > { %s3577_s26 = scalar_lea.hbm %s4001_s14, 6144  ;;  %p3583_p1 = scmp.lt.u32.totalorder %s4001_s14, %s4706_s3 }
  0x44   : > { %p3578_p5 = scmp.ne.s32.totalorder %s4001_s14, %s3577_s26  ;;  %p3584_p3 = scmp.lt.u32.totalorder %s3582_s11, %s3577_s26 }
  0x45   : > { %s4709_s21 = scalar_select %p4013_p9, 1, 0 }
  0x46   : > { %p3580_p10 = pnand %p4013_p9, %p3578_p5  ;;  %p3585_p6 = por %p3584_p3, %p3583_p1 }
  0x47   : > { %p3586_p4 = scmp.lt.u32.totalorder %s3577_s26, %s4001_s14 }
  0x48   : > { %p3581_p0 = pneg %p3580_p10 }
  0x49   : > { %p3587_p7 = por %p3586_p4, %p3585_p6 }
  0x4b   : > { %p3588_p11 = pnand %p3587_p7, %p3581_p0 }
  0x4d   : > { %3591 = shalt.err (!%p3588_p11)
}
  0x4e   : > { %s3592_s8 = scalar_lea.vmem %s4003_s10, 6144  ;;  %s3802_s22 = smov [#allocation8]  }
  0x4f   : > { %p3593_p13 = scmp.ne.s32.totalorder %s4003_s10, %s3592_s8  ;;  %s3597_s0 = sshll.u32 %s3802_s22, 4  ;;  %s3598_s0 = int_to_ptr.vmem [resolvable:$false] %s3597_s0 }
  0x50   : > { %s3599_s28 = scalar_lea.vmem %s3598_s0, 12288  ;;  %p3600_p2 = scmp.lt.s32.totalorder %s4003_s10, %s3598_s0 }
  0x51   : > { %p3595_p5 = pnand %p3593_p13, %p4013_p9  ;;  %p3601_p12 = scmp.lt.s32.totalorder %s3599_s28, %s3592_s8 }
  0x53   : > { %p3596_p10 = pneg %p3595_p5  ;;  %p3602_p1 = por %p3601_p12, %p3600_p2 }
  0x55   : > { %p3603_p3 = pnand %p3602_p1, %p3596_p10 }
  0x57   : > { %3606 = shalt.err (!%p3603_p3)
}
  0x58   : > { %s3803_s26 = smov 384   ;;  %s3804_s11 = smov 24  }
  0x59   : > { %3381 = dma.hbm_to_vmem [thread:$0]  (!%p4708_p8), %s4001_s14, 6144, %s4003_s10, %s4007_s4, %s3803_s26, %s3803_s26, %s3804_s11  }
  0x5a   : > { %s2671_s15 = sshll.u32 %s3797_s16, 12  ;;  %s491_s20 = scalar_lea.vmem [#allocation9], %s2582_s25 }
  0x5b   : > { %s498_s22 = sshll.u32 %s491_s20, 4  ;;  %s4710_s7 = sld [smem:[#allocation26_spill]]  ;;  %s4047_s22 = int_to_ptr.vmem [resolvable:$true] %s498_s22 }
  0x61   : > { %s4045_s28 = scalar_lea.hbm %s4710_s7, %s2671_s15  ;;  %s3612_s26 = scalar_lea.hbm %s4710_s7, 8192 }
  0x62   : > { %s3607_s13 = scalar_lea.hbm %s4045_s28, 4096  ;;  %p3613_p6 = scmp.lt.u32.totalorder %s4045_s28, %s4710_s7 }
  0x63   : > { %p3608_p12 = scmp.ne.s32.totalorder %s4045_s28, %s3607_s13  ;;  %p3614_p4 = scmp.lt.u32.totalorder %s3612_s26, %s3607_s13 }
  0x64   : > { %p3616_p11 = scmp.lt.u32.totalorder %s3607_s13, %s4045_s28 }
  0x65   : > { %p3610_p2 = pnand %p3608_p12, %p4013_p9  ;;  %p3615_p7 = por %p3614_p4, %p3613_p6 }
  0x67   : > { %p3611_p0 = pneg %p3610_p2  ;;  %p3617_p13 = por %p3616_p11, %p3615_p7 }
  0x69   : > { %p3618_p5 = pnand %p3617_p13, %p3611_p0 }
  0x6b   : > { %3621 = shalt.err (!%p3618_p5)
}
  0x6c   : > { %s3622_s8 = scalar_lea.vmem %s4047_s22, 4096  ;;  %s3805_s0 = smov [#allocation9]  }
  0x6d   : > { %p3623_p10 = scmp.ne.s32.totalorder %s4047_s22, %s3622_s8  ;;  %s3627_s10 = sshll.u32 %s3805_s0, 4  ;;  %s3628_s10 = int_to_ptr.vmem [resolvable:$false] %s3627_s10 }
  0x6e   : > { %s3629_s14 = scalar_lea.vmem %s3628_s10, 8192  ;;  %p3630_p12 = scmp.lt.s32.totalorder %s4047_s22, %s3628_s10 }
  0x6f   : > { %p3625_p1 = pnand %p3623_p10, %p4013_p9  ;;  %p3631_p2 = scmp.lt.s32.totalorder %s3629_s14, %s3622_s8 }
  0x71   : > { %p3626_p3 = pneg %p3625_p1  ;;  %p3632_p6 = por %p3631_p2, %p3630_p12 }
  0x73   : > { %p3633_p4 = pnand %p3632_p6, %p3626_p3 }
  0x75   : > { %3636 = shalt.err (!%p3633_p4)
}
  0x76   : > { %s3806_s13 = smov 256   ;;  %s3807_s26 = smov 16  }
  0x77   : > { %3384 = dma.hbm_to_vmem [thread:$0]  (!%p4708_p8), %s4045_s28, 4096, %s4047_s22, %s4007_s4, %s3806_s13, %s3806_s13, %s3807_s26  }
  0x78   : > { %s4076_s0 = scalar_lea.hbm %s4660_s9, %s2671_s15  ;;  %s519_s8 = scalar_lea.vmem [#allocation10], %s2582_s25 }
  0x79   : > { %s526_s10 = sshll.u32 %s519_s8, 4  ;;  %s3808_s14 = smov [#allocation6]   ;;  %s4080_s10 = int_to_ptr.vmem [resolvable:$true] %s526_s10 }
  0x7a   : > { %s4082_s18 = sshll.u32 %s3808_s14, 4  ;;  %s3637_s1 = scalar_lea.hbm %s4076_s0, 4096  ;;  %s432_s18 = int_to_ptr.vmem [resolvable:$true] %s4082_s18 }
  0x7b   : > { %p3638_p0 = scmp.ne.s32.totalorder %s4076_s0, %s3637_s1  ;;  %s3642_s28 = scalar_lea.hbm %s4660_s9, 8192 }
  0x7c   : > { %p3643_p13 = scmp.lt.u32.totalorder %s4076_s0, %s4660_s9  ;;  %p3644_p5 = scmp.lt.u32.totalorder %s3642_s28, %s3637_s1 }
  0x7d   : > { %p3640_p7 = pnand %p3638_p0, %p4013_p9  ;;  %p3646_p1 = scmp.lt.u32.totalorder %s3637_s1, %s4076_s0 }
  0x7e   : > { %p3645_p10 = por %p3644_p5, %p3643_p13 }
  0x7f   : > { %p3641_p11 = pneg %p3640_p7 }
  0x80   : > { %p3647_p3 = por %p3646_p1, %p3645_p10 }
  0x82   : > { %p3648_p12 = pnand %p3647_p3, %p3641_p11 }
  0x84   : > { %3651 = shalt.err (!%p3648_p12)
}
  0x85   : > { %s3652_s25 = scalar_lea.vmem %s4080_s10, 4096  ;;  %s3809_s11 = smov [#allocation10]  }
  0x86   : > { %p3653_p2 = scmp.ne.s32.totalorder %s4080_s10, %s3652_s25  ;;  %s3657_s20 = sshll.u32 %s3809_s11, 4  ;;  %s3658_s20 = int_to_ptr.vmem [resolvable:$false] %s3657_s20 }
  0x87   : > { %s3659_s8 = scalar_lea.vmem %s3658_s20, 8192  ;;  %p3660_p0 = scmp.lt.s32.totalorder %s4080_s10, %s3658_s20 }
  0x88   : > { %p3655_p6 = pnand %p3653_p2, %p4013_p9  ;;  %p3661_p7 = scmp.lt.s32.totalorder %s3659_s8, %s3652_s25 }
  0x8a   : > { %p3656_p4 = pneg %p3655_p6  ;;  %p3662_p13 = por %p3661_p7, %p3660_p0 }
  0x8c   : > { %p3663_p5 = pnand %p3662_p13, %p3656_p4 }
  0x8e   : > { %3666 = shalt.err (!%p3663_p5)
}
  0x8f   : > { %s4711_s1 = smov 8   ;;  %s4712_s14 = smov 128  }
  0x90   : > { %3387 = dma.hbm_to_vmem [thread:$0]  (!%p4708_p8), %s4076_s0, 4096, %s4080_s10, %s4007_s4, %s4712_s14, %s4712_s14, %s4711_s1  }
  0x91   : > { %s4713_s2 = sld [smem:[#allocation22_spill]]  ;;  %p4714_p10 = scmp.ne.s32.totalorder %s4703_s27, 0 }
  0x93   : > { %p4715_p1 = pneg %p4714_p10 }
  0x97   : > { %s3667_s28 = scalar_lea.hbm %s4713_s2, 1024 }
  0x98   : > { %p3668_p11 = scmp.ne.s32.totalorder %s4713_s2, %s3667_s28  ;;  %p3674_p2 = scmp.lt.u32.totalorder %s3667_s28, %s4713_s2 }
  0x9a   : > { %p3670_p3 = pnand %p3668_p11, %p4715_p1 }
  0x9c   : > { %p3671_p12 = pneg %p3670_p3 }
  0x9e   : > { %p3676_p6 = pnand %p3674_p2, %p3671_p12 }
  0xa0   : > { %3679 = shalt.err (!%p3676_p6)
}
  0xa1   : > { %s3680_s0 = scalar_lea.vmem %s432_s18, 1024  ;;  %p4716_p0 = pmov %p4715_p1 }
  0xa2   : > { %p3681_p4 = scmp.ne.s32.totalorder %s432_s18, %s3680_s0  ;;  %p3688_p5 = scmp.lt.s32.totalorder %s432_s18, %s432_s18 }
  0xa3   : > { %p3689_p8 = scmp.lt.s32.totalorder %s3680_s0, %s3680_s0 }
  0xa4   : > { %p3683_p7 = pnand %p3681_p4, %p4716_p0 }
  0xa5   : > { %p3690_p9 = por %p3689_p8, %p3688_p5 }
  0xa6   : > { %p3684_p13 = pneg %p3683_p7 }
  0xa8   : > { %p3691_p1 = pnand %p3690_p9, %p3684_p13 }
  0xaa   : > { %3694 = shalt.err (!%p3691_p1)
}
  0xab   : > { %3377 = dma.hbm_to_vmem [thread:$0]  (!%p4714_p10), %s4713_s2, 1024, %s432_s18, [#allocation7], %s4712_s14, %s4712_s14, %s4711_s1  }
  0xac   : > { %s2588_s8 = sshll.u32 %s3797_s16, 4  ;;  %s551_s22 = scalar_lea.vmem [#allocation11], %s3962_s29 }
  0xad   : > { %s558_s15 = sshll.u32 %s551_s22, 4  ;;  %s556_s26 = scalar_lea.hbm %s4663_s12, %s2588_s8  ;;  %s559_s15 = int_to_ptr.vmem [resolvable:$true] %s558_s15 }
  0xae   : > { %s3695_s25 = scalar_lea.hbm %s556_s26, 16  ;;  %p4717_p9 = scmp.ne.s32.totalorder %s4709_s21, 0 }
  0xaf   : > { %p3696_p8 = scmp.ne.s32.totalorder %s556_s26, %s3695_s25  ;;  %s3700_s0 = scalar_lea.hbm %s4663_s12, 32 }
  0xb0   : > { %p3701_p10 = scmp.lt.u32.totalorder %s556_s26, %s4663_s12  ;;  %p3702_p12 = scmp.lt.u32.totalorder %s3700_s0, %s3695_s25 }
  0xb1   : > { %p3698_p11 = pnand %p3696_p8, %p4717_p9  ;;  %p3704_p6 = scmp.lt.u32.totalorder %s3695_s25, %s556_s26 }
  0xb2   : > { %p3703_p2 = por %p3702_p12, %p3701_p10 }
  0xb3   : > { %p3699_p3 = pneg %p3698_p11 }
  0xb4   : > { %p3705_p4 = por %p3704_p6, %p3703_p2 }
  0xb6   : > { %p3706_p0 = pnand %p3705_p4, %p3699_p3 }
  0xb8   : > { %3709 = shalt.err (!%p3706_p0)
}
  0xb9   : > { %s3710_s16 = scalar_lea.vmem %s559_s15, 16  ;;  %s3810_s29 = smov [#allocation11]  }
  0xba   : > { %p3711_p7 = scmp.ne.s32.totalorder %s559_s15, %s3710_s16  ;;  %s3715_s18 = sshll.u32 %s3810_s29, 4  ;;  %s3716_s18 = int_to_ptr.vmem [resolvable:$false] %s3715_s18 }
  0xbb   : > { %s3717_s1 = scalar_lea.vmem %s3716_s18, 32  ;;  %p3718_p1 = scmp.lt.s32.totalorder %s559_s15, %s3716_s18 }
  0xbc   : > { %p3713_p13 = pnand %p3711_p7, %p4717_p9  ;;  %p3719_p8 = scmp.lt.s32.totalorder %s3717_s1, %s3710_s16 }
  0xbe   : > { %p3714_p5 = pneg %p3713_p13  ;;  %p3720_p11 = por %p3719_p8, %p3718_p1 }
  0xc0   : > { %p3721_p10 = pnand %p3720_p11, %p3714_p5 }
  0xc2   : > { %3724 = shalt.err (!%p3721_p10)
}
  0xc3   : > { %p4718_p12 = scmp.ne.s32.totalorder %s4704_s19, 0  ;;  %p4719_p3 = scmp.ne.s32.totalorder %s4702_s24, 0 }
  0xc4   : > { %p4720_p2 = scmp.eq.s32.totalorder (!%p4719_p3), %s3918_s17, 0 }
  0xc5   : > { %3390 = dma.hbm_to_vmem [thread:$0]  (!%p4718_p12), %s556_s26, 16, %s559_s15, %s4007_s4  }
  0xc6   : > { %567 = sbr.rel (%p4719_p3) target bundleno = 2966 (0xb96), region = 72 }
  0xcd   : > { %3768 = dma.done.wait (%p4720_p2), [#allocation4], 1024   ;;  %p4721_p9 = pmov %p4720_p2 }
  0xce   : > { %p4722_p6 = pmov %p4720_p2 }
  0xcf   : > { %3770 = vsyncadd (%p4721_p9), [#allocation4], 4294966272 }
  0xd0   : > { %3772 = dma.done.wait (%p4722_p6), [#allocation7], 1024   ;;  %p4723_p4 = pmov %p4720_p2 }
  0xd1   : > { %s577_s19 = sand.u32 1, %s3918_s17   ;;  %s4163_s4 = sand.u32 1, %s3789_s30  }
  0xd2   : > { %3774 = vsyncadd (%p4723_p4), [#allocation7], 4294966272  ;;  %s3349_s24 = smul.u32 384, %s4163_s4  ;;  %s578_s21 = scalar_lea.sflag [#allocation4], %s577_s19 }
  0xd3   : > { %p4724_p0 = scmp.ne.s32.totalorder %s4701_s23, 0 }
  0xd4   : > { %s4166_s14 = scalar_lea.vmem [#allocation8], %s3349_s24 }
  0xd5   : > { %3776 = dma.done.wait (%p4724_p0), %s578_s21, 14352  }
  0xd6   : > { %3778 = vsyncadd (%p4724_p0), %s578_s21, 4294952944  ;;  %s2592_s8 = sshll.u32 %s4163_s4, 8  ;;  %p688_p7 = scmp.lt.s32.totalorder %s3918_s17, 1 }
  0xd7   : > { %s4725_s5 = sld [smem:[#allocation25_spill]]  ;;  %s4726_s20 = sld [smem:[#allocation24_spill]] }
  0xd8   : > { %s4175_s22 = scalar_select %p688_p7, %s3918_s17, 1 }
  0xd9   : > { %s4727_s19 = sld [smem:[#allocation27_spill]]  ;;  %s4728_s13 = sld [smem:[#allocation28_spill]] }
  0xda   : > { %s3350_s15 = smul.u32 3, %s4175_s22  ;;  %s2673_s28 = sshll.u32 %s4175_s22, 7 }
  0xdb   : > { %s2596_s29 = sshll.u32 %s4175_s22, 1  ;;  %s2674_s27 = sshll.u32 %s4175_s22, 6 }
  0xdc   : > { %s4730_s0 = sld [smem:[#allocation31_spill]]  ;;  %s4213_s10 = scalar_lea.vmem [#allocation9], %s2592_s8 }
  0xdd   : > { %s4182_s26 = scalar_lea.vmem %s4725_s5, %s2673_s28  ;;  %s4191_s16 = scalar_lea.vmem %s4726_s20, %s3350_s15 }
  0xde   : > { %s4729_s5 = sld [smem:[#allocation29_spill]]  ;;  %s4215_s20 = scalar_lea.vmem [#allocation10], %s2592_s8 }
  0xdf   : > { %s4197_s24 = scalar_lea.vmem %s4727_s19, %s2596_s29  ;;  %s706_s28 = scalar_lea.vmem %s4728_s13, %s4175_s22 }
  0xe0   : > { %s607_s29 = scalar_lea.vmem [#allocation11], %s4163_s4  ;;  %p4731_p13 = scmp.ne.s32.totalorder %s3918_s17, 0 }
  0xe1   : > { %s4732_s1 = sld [smem:[#allocation20_spill]] (!%p4731_p13) }
  0xe2   : > { %s4211_s15 = scalar_lea.vmem %s4730_s0, %s2674_s27  ;;  %718 = sbr.rel (%p4731_p13) target bundleno = 233 (0xe9), region = 100 }
  0xe4   : > { %s709_s25 = scalar_lea.vmem %s4729_s5, %s4175_s22 }
  0xe7   : > { %v719_v0 = vld [vmem:[%s4732_s1] sm:$0xff] (!%p4731_p13)  ;;  %v720_v1 = vld [vmem:[%s4732_s1 + $0x8] sm:$0xff] (!%p4731_p13) }
  0xe8   : > { %721 = vst [vmem:[#allocation2] sm:$0xff] (!%p4731_p13), %v719_v0  ;;  %722 = vst [vmem:[#allocation2 + $0x8] sm:$0xff] (!%p4731_p13), %v720_v1 }
  0xe9 PF: > { %v726_v2 = vld [vmem:[%s4166_s14 + $0x8] sm:$0xff]  ;;  %v729_v3 = vld [vmem:[%s4166_s14 + $0x20] sm:$0xff]  ;;  %v728_v6 = vld [vmem:[%s4166_s14 + $0x18] sm:$0xff]  ;;  %v3811_v9 = vmov 0.0   ;;  %s3812_s7 = smov 32   ;;  %vm970_vm0 = vcmask 523264   ;;  %s4735_s19 = scalar_lea.vmem %s4657_s6, %s4175_s22 }
  0xea   : > { %v725_v4 = vld [vmem:[%s4166_s14] sm:$0xff]  ;;  %v3083_v5 = vpack.c.bf16 %v729_v3, %v726_v2  ;;  %v732_v7 = vld [vmem:[%s4166_s14 + $0x38] sm:$0xff]  ;;  %v735_v8 = vld [vmem:[%s4166_s14 + $0x50] sm:$0xff]  ;;  %854 = vmatprep.mubr.f32.mxu0 %v3811_v9  ;;  %s3814_s8 = smov 64   ;;  %vm1358_vm1 = vcmask 261120   ;;  %vm1600_vm3 = vcmask 64512  }
  0xeb   : > { %v3085_v10 = vpack.c.bf16 %v728_v6, %v725_v4  ;;  %v3087_v11 = vpack.c.bf16 %v735_v8, %v732_v7  ;;  %v731_v12 = vld [vmem:[%s4166_s14 + $0x30] sm:$0xff]  ;;  %v734_v13 = vld [vmem:[%s4166_s14 + $0x48] sm:$0xff]  ;;  %v741_v15 = vld [vmem:[%s4166_s14 + $0x80] sm:$0xff]  ;;  %s3815_s11 = smov 120   ;;  %vm1955_vm4 = vcmask 785408   ;;  %s3816_s23 = smov 112  }
  0xec   : > { %v738_v14 = vld [vmem:[%s4166_s14 + $0x68] sm:$0xff]  ;;  %3084 = vmatprep.subr.bf16.mxu0 %v3083_v5  ;;  %v3089_v16 = vpack.c.bf16 %v734_v13, %v731_v12  ;;  %v737_v18 = vld [vmem:[%s4166_s14 + $0x60] sm:$0xff]  ;;  %v740_v19 = vld [vmem:[%s4166_s14 + $0x78] sm:$0xff]  ;;  %s3817_s27 = smov 104   ;;  %s3819_s0 = smov 80  }
  0xed   : > { %3086 = vmatpush1.bf16.msra.mxu0 %v3085_v10  ;;  %v3091_v17 = vpack.c.bf16 %v741_v15, %v738_v14  ;;  %v744_v20 = vld [vmem:[%s4166_s14 + $0x98] sm:$0xff]  ;;  %v747_v21 = vld [vmem:[%s4166_s14 + $0xb0] sm:$0xff]  ;;  %v3093_v22 = vpack.c.bf16 %v740_v19, %v737_v18  ;;  %v746_v25 = vld [vmem:[%s4166_s14 + $0xa8] sm:$0xff]  ;;  %v775_v14 = vlaneseq  ;;  %s3821_s3 = smov [#allocation12]   ;;  %p3396_p5 = scmp.eq.s32.totalorder %s3918_s17, 1 }
  0xee   : > { %3088 = vmatprep.subr.bf16.mxu0 %v3087_v11  ;;  %v3095_v23 = vpack.c.bf16 %v747_v21, %v744_v20  ;;  %v743_v24 = vld [vmem:[%s4166_s14 + $0x90] sm:$0xff]  ;;  %v750_v26 = vld [vmem:[%s4166_s14 + $0xc8] sm:$0xff]  ;;  %v753_v27 = vld [vmem:[%s4166_s14 + $0xe0] sm:$0xff]  ;;  %s2355_s5 = sshll.u32 %s3821_s3, 4  ;;  %s2356_s5 = int_to_ptr.vmem [resolvable:$true] %s2355_s5 }
  0xef   : > { %v4245_v28 = vld [vmem:[#allocation2] sm:$0xff]  ;;  %v730_v30 = vld [vmem:[%s4166_s14 + $0x28] sm:$0xff]  ;;  %v3097_v31 = vpack.c.bf16 %v746_v25, %v743_v24  ;;  %v749_v32 = vld [vmem:[%s4166_s14 + $0xc0] sm:$0xff]  ;;  %v3099_v36 = vpack.c.bf16 %v753_v27, %v750_v26  ;;  %v4280_v15 = vshrl.u32 %v775_v14, 7  ;;  %s3725_s22 = scalar_lea.vmem %s2356_s5, 256  ;;  %p3732_p10 = scmp.lt.s32.totalorder %s2356_s5, %s2356_s5 }
  0xf0   : > { %v727_v29 = vld [vmem:[%s4166_s14 + $0x10] sm:$0xff]  ;;  %2877 = vmatprep.mubr.f32.mxu1 %v4245_v28  ;;  %v733_v34 = vld [vmem:[%s4166_s14 + $0x40] sm:$0xff]  ;;  %v736_v35 = vld [vmem:[%s4166_s14 + $0x58] sm:$0xff]  ;;  %p3726_p1 = scmp.ne.s32.totalorder %s2356_s5, %s3725_s22  ;;  %p3733_p12 = scmp.lt.s32.totalorder %s3725_s22, %s3725_s22 }
  0xf1   : > { %3090 = vmatpush1.bf16.msra.mxu0 %v3089_v16  ;;  %v3115_v33 = vpack.c.bf16 %v730_v30, %v727_v29  ;;  %v752_v37 = vld [vmem:[%s4166_s14 + $0xd8] sm:$0xff]  ;;  %v3119_v38 = vpack.c.bf16 %v736_v35, %v733_v34  ;;  %v739_v39 = vld [vmem:[%s4166_s14 + $0x70] sm:$0xff]  ;;  %v742_v40 = vld [vmem:[%s4166_s14 + $0x88] sm:$0xff]  ;;  %v777_v16 = vsub.s32 0, %v4280_v15  ;;  %v781_v18 = vsub.s32 1, %v4280_v15 }
  0xf2   : > { %3092 = vmatprep.subr.bf16.mxu0 %v3091_v17  ;;  %v756_v41 = vld [vmem:[%s4166_s14 + $0xf8] sm:$0xff]  ;;  %v759_v42 = vld [vmem:[%s4166_s14 + $0x110] sm:$0xff]  ;;  %v3101_v43 = vpack.c.bf16 %v752_v37, %v749_v32  ;;  %v3123_v45 = vpack.c.bf16 %v742_v40, %v739_v39  ;;  %v758_v47 = vld [vmem:[%s4166_s14 + $0x108] sm:$0xff]  ;;  %v785_v34 = vsub.s32 2, %v4280_v15  ;;  %p3727_p8 = pnand %p3726_p1, %p3396_p5  ;;  %p3734_p3 = por %p3733_p12, %p3732_p10 }
  0xf3   : > { %3116 = vmatprep.subr.bf16.mxu1 %v3115_v33  ;;  %v755_v44 = vld [vmem:[%s4166_s14 + $0xf0] sm:$0xff]  ;;  %v3103_v46 = vpack.c.bf16 %v759_v42, %v756_v41  ;;  %v745_v48 = vld [vmem:[%s4166_s14 + $0xa0] sm:$0xff]  ;;  %v748_v49 = vld [vmem:[%s4166_s14 + $0xb8] sm:$0xff] }
  0xf4   : > { %3118 = vmatpush3.bf16.msra.mxu1 %v3115_v33  ;;  %v762_v50 = vld [vmem:[%s4166_s14 + $0x128] sm:$0xff]  ;;  %v765_v51 = vld [vmem:[%s4166_s14 + $0x140] sm:$0xff]  ;;  %v3105_v52 = vpack.c.bf16 %v758_v47, %v755_v44  ;;  %v3127_v54 = vpack.c.bf16 %v748_v49, %v745_v48  ;;  %v764_v56 = vld [vmem:[%s4166_s14 + $0x138] sm:$0xff]  ;;  %p3728_p11 = pneg %p3727_p8 }
  0xf5   : > { %3094 = vmatpush1.bf16.msra.mxu0 %v3093_v22  ;;  %3120 = vmatprep.subr.bf16.mxu1 %v3119_v38  ;;  %v761_v53 = vld [vmem:[%s4166_s14 + $0x120] sm:$0xff]  ;;  %v3107_v55 = vpack.c.bf16 %v765_v51, %v762_v50  ;;  %v751_v57 = vld [vmem:[%s4166_s14 + $0xd0] sm:$0xff]  ;;  %v754_v58 = vld [vmem:[%s4166_s14 + $0xe8] sm:$0xff] }
  0xf6   : > { %3096 = vmatprep.subr.bf16.mxu0 %v3095_v23  ;;  %v768_v59 = vld [vmem:[%s4166_s14 + $0x158] sm:$0xff]  ;;  %v771_v60 = vld [vmem:[%s4166_s14 + $0x170] sm:$0xff]  ;;  %v3109_v61 = vpack.c.bf16 %v764_v56, %v761_v53  ;;  %v3131_v63 = vpack.c.bf16 %v754_v58, %v751_v57  ;;  %v770_v1 = vld [vmem:[%s4166_s14 + $0x168] sm:$0xff]  ;;  %p3735_p2 = pnand %p3734_p3, %p3728_p11 }
  0xf7   : > { %v767_v62 = vld [vmem:[%s4166_s14 + $0x150] sm:$0xff]  ;;  %v3111_v0 = vpack.c.bf16 %v771_v60, %v768_v59  ;;  %v757_v2 = vld [vmem:[%s4166_s14 + $0x100] sm:$0xff]  ;;  %v760_v3 = vld [vmem:[%s4166_s14 + $0x118] sm:$0xff] }
  0xf8   : > { %3122 = vmatpush3.bf16.msra.mxu1 %v3119_v38  ;;  %v3113_v4 = vpack.c.bf16 %v770_v1, %v767_v62  ;;  %v3135_v5 = vpack.c.bf16 %v760_v3, %v757_v2  ;;  %v724_v6 = vld [vmem:[#allocation2 + $0x8] sm:$0xff]  ;;  %v763_v7 = vld [vmem:[%s4166_s14 + $0x130] sm:$0xff]  ;;  %v766_v8 = vld [vmem:[%s4166_s14 + $0x148] sm:$0xff] }
  0xf9   : > { %3098 = vmatpush1.bf16.msra.mxu0 %v3097_v31  ;;  %3124 = vmatprep.subr.bf16.mxu1 %v3123_v45  ;;  %v3139_v10 = vpack.c.bf16 %v766_v8, %v763_v7  ;;  %v769_v11 = vld [vmem:[%s4166_s14 + $0x160] sm:$0xff]  ;;  %v772_v12 = vld [vmem:[%s4166_s14 + $0x178] sm:$0xff]  ;;  %v773_v17 = vld [vmem:[%s4191_s16] sm:$0x7]  ;;  %s3813_s14 = smov 96  }
  0xfa   : > { %3100 = vmatprep.subr.bf16.mxu0 %v3099_v36  ;;  %v3143_v13 = vpack.c.bf16 %v772_v12, %v769_v11  ;;  %v778_v20 = vrot.slane %v773_v17, %v777_v16  ;;  %v782_v22 = vrot.slane %v773_v17, %v781_v18  ;;  %v4291_v33 = vld [vmem:[#allocation3] sm:$0xff]  ;;  %v786_v35 = vrot.slane %v773_v17, %v785_v34  ;;  %v4305_v2 = vld [vmem:[#allocation3 + $0x8] sm:$0xff]  ;;  %v4307_v3 = vld [vmem:[#allocation3 + $0x10] sm:$0xff] }
  0xfb   : > { %v4327_v7 = vld [vmem:[#allocation3 + $0x30] sm:$0xff]  ;;  %v4335_v8 = vld [vmem:[#allocation3 + $0x38] sm:$0xff]  ;;  %vm4365_vm2 = vmpackc.low %vm1358_vm1, %vm1358_vm1 }
  0xfc   : > { %3126 = vmatpush3.bf16.msra.mxu1 %v3123_v45  ;;  %v2664_v15 = vld [vmem:[%s706_s28] ss:$0 sm:$0xff]  ;;  %s3818_s28 = smov 88  }
  0xfd   : > { %3102 = vmatpush1.bf16.msra.mxu0 %v3101_v43  ;;  %3128 = vmatprep.subr.bf16.mxu1 %v3127_v54 }
  0xfe   : > { %3104 = vmatprep.subr.bf16.mxu0 %v3103_v46 }
 0x100   : > { %3130 = vmatpush3.bf16.msra.mxu1 %v3127_v54 }
 0x101   : > { %3106 = vmatpush1.bf16.msra.mxu0 %v3105_v52  ;;  %3132 = vmatprep.subr.bf16.mxu1 %v3131_v63 }
 0x102   : > { %3108 = vmatprep.subr.bf16.mxu0 %v3107_v55 }
 0x104   : > { %3134 = vmatpush3.bf16.msra.mxu1 %v3131_v63 }
 0x105   : > { %3110 = vmatpush1.bf16.msra.mxu0 %v3109_v61  ;;  %3136 = vmatprep.subr.bf16.mxu1 %v3135_v5 }
 0x106   : > { %3112 = vmatprep.subr.bf16.mxu0 %v3111_v0 }
 0x108   : > { %3138 = vmatpush3.bf16.msra.mxu1 %v3135_v5  ;;  %v4315_v5 = vld [vmem:[#allocation3 + $0x20] sm:$0xff] }
 0x109   : > { %3114 = vmatpush1.bf16.msra.mxu0 %v3113_v4  ;;  %3140 = vmatprep.subr.bf16.mxu1 %v3139_v10  ;;  %v4313_v4 = vld [vmem:[#allocation3 + $0x18] sm:$0xff] }
 0x10c   : > { %855 = vmatmul.mubr.f32.vlgmr.msra.gmra.mrb[0].mxu0 %v4245_v28  ;;  %3142 = vmatpush3.bf16.msra.mxu1 %v3139_v10 }
 0x10d   : > { %860 = vmatprep.mubr.f32.mxu0 %v3811_v9  ;;  %3144 = vmatprep.subr.bf16.mxu1 %v3143_v13 }
 0x110   : > { %861 = vmatmul.mubr.f32.gmra.mrb[2].mxu0 %v724_v6  ;;  %3146 = vmatpush3.bf16.msra.mxu1 %v3143_v13 }
 0x111   : > { %2896 = vmatprep.mubr.msk.f32.mxu0 %vm970_vm0, %v4291_v33 }
 0x113   : > { %2878 = vmatmul.mubr.f32.vlgmr.msra.gmra.mrb[0].mxu1 %v724_v6  ;;  %v4323_v6 = vld [vmem:[#allocation3 + $0x28] sm:$0xff] }
 0x114   : > { %2924 = vmatprep.mubr.msk.f32.mxu1 %vm970_vm0, %v4291_v33 }
 0x1df   : > { %v856_v19 = vpop.f32.mrb[0].mxu0 }
 0x1e0   : > { %v858_v21 = vpop.f32.mrb[1].mxu0  ;;  %v857_v24 = vadd.f32 %v856_v19, %v778_v20 }
 0x1e1   : > { %v859_v27 = vadd.f32 %v858_v21, %v782_v22 }
 0x1e3   : > { %v862_v23 = vpop.f32.mrb[2].mxu0 }
 0x1e4   : > { %v863_v25 = vadd.f32 %v862_v23, %v778_v20  ;;  %v864_v26 = vpop.f32.mrb[3].mxu0 }
 0x1e5   : > { %v865_v28 = vadd.f32 %v864_v26, %v782_v22 }
 0x1e6   : > { %v3147_v29 = vpack.c.bf16 %v863_v25, %v857_v24  ;;  %v3466_v30 = vpack.i.bf16 %v863_v25, %v857_v24  ;;  %v2879_v36 = vpop.f32.mrb[0].mxu1 }
 0x1e7   : > { %v3461_v31 = vpack.i.bf16 %v865_v28, %v859_v27  ;;  %v3163_v32 = vpack.c.bf16 %v865_v28, %v859_v27  ;;  %v939_v37 = vadd.f32 %v2879_v36, %v786_v35  ;;  %v933_v38 = vpop.f32.mrb[1].mxu1 }
 0x1e8   : > { %3148 = vmatprep.subr.bf16.mxu0 %v3147_v29  ;;  %v934_v39 = vadd.f32 %v933_v38, %v786_v35 }
 0x1e9   : > { %3462 = vrot.lane.b32.xlu1 %v3461_v31, %s3812_s7  ;;  %3452 = vrot.lane.b32.xlu0 %v3461_v31, %s3813_s14 }
 0x1ea   : > { %3150 = vmatpush3.bf16.msra.mxu0 %v3147_v29  ;;  %3164 = vmatprep.subr.bf16.mxu1 %v3163_v32  ;;  %v3481_v40 = vpack.i.bf16 %v939_v37, %v934_v39  ;;  %v3179_v41 = vpack.c.bf16 %v939_v37, %v934_v39 }
 0x1eb   : > { %3166 = vmatpush3.bf16.msra.mxu1 %v3163_v32 }
 0x1ed   : > { %3457 = vrot.lane.b32.xlu0 %v3461_v31, %s3814_s8  ;;  %3467 = vrot.lane.b32.xlu1 %v3466_v30, %s3813_s14 }
 0x1f1   : > { %3472 = vrot.lane.b32.xlu0 %v3466_v30, %s3814_s8  ;;  %3477 = vrot.lane.b32.xlu1 %v3466_v30, %s3812_s7 }
 0x1f5   : > { %3482 = vrot.lane.b32.xlu0 %v3481_v40, %s3813_s14  ;;  %3487 = vrot.lane.b32.xlu1 %v3481_v40, %s3814_s8 }
 0x1f9   : > { %3492 = vrot.lane.b32.xlu0 %v3481_v40, %s3812_s7 }
 0x25b   : > { %v3463_v42 = vpop.permute.xlu1 %3462  ;;  %v3453_v43 = vpop.permute.xlu0 %3452 }
 0x25c   : > { %v3455_v44 = vunpack.i.h.bf16 %v3453_v43  ;;  %v3454_v45 = vunpack.i.l.bf16 %v3453_v43  ;;  %v3465_v47 = vunpack.i.h.bf16 %v3463_v42  ;;  %v3464_v48 = vunpack.i.l.bf16 %v3463_v42 }
 0x25e   : > { %v3167_v46 = vpack.c.bf16 %v3455_v44, %v3454_v45  ;;  %v3175_v57 = vpack.c.bf16 %v3465_v47, %v3464_v48  ;;  %v1351_v47 = vld [vmem:[#allocation6 + $0x8] sm:$0xff]  ;;  %v1350_v48 = vld [vmem:[#allocation6] sm:$0xff] }
 0x25f   : > { %v3458_v49 = vpop.permute.xlu0 %3457  ;;  %v3468_v50 = vpop.permute.xlu1 %3467 }
 0x260   : > { %v3460_v51 = vunpack.i.h.bf16 %v3458_v49  ;;  %v3459_v52 = vunpack.i.l.bf16 %v3458_v49  ;;  %v3470_v53 = vunpack.i.h.bf16 %v3468_v50  ;;  %v3469_v54 = vunpack.i.l.bf16 %v3468_v50  ;;  %3168 = vmatprep.subr.bf16.mxu1 %v3167_v46 }
 0x261   : > { %3170 = vmatpush3.bf16.msra.mxu1 %v3167_v46 }
 0x262   : > { %v3171_v55 = vpack.c.bf16 %v3460_v51, %v3459_v52  ;;  %v3151_v56 = vpack.c.bf16 %v3470_v53, %v3469_v54  ;;  %v1353_v53 = vld [vmem:[#allocation6 + $0x18] sm:$0xff] }
 0x263   : > { %v3473_v58 = vpop.permute.xlu0 %3472  ;;  %v3478_v59 = vpop.permute.xlu1 %3477 }
 0x264   : > { %v3475_v60 = vunpack.i.h.bf16 %v3473_v58  ;;  %v3474_v61 = vunpack.i.l.bf16 %v3473_v58  ;;  %v3480_v62 = vunpack.i.h.bf16 %v3478_v59  ;;  %v3479_v63 = vunpack.i.l.bf16 %v3478_v59  ;;  %3152 = vmatprep.subr.bf16.mxu0 %v3151_v56  ;;  %3172 = vmatprep.subr.bf16.mxu1 %v3171_v55 }
 0x265   : > { %3154 = vmatpush3.bf16.msra.mxu0 %v3151_v56  ;;  %3174 = vmatpush3.bf16.msra.mxu1 %v3171_v55  ;;  %v1352_v55 = vld [vmem:[#allocation6 + $0x10] sm:$0xff] }
 0x266   : > { %v3155_v0 = vpack.c.bf16 %v3475_v60, %v3474_v61  ;;  %3176 = vmatprep.subr.bf16.mxu1 %v3175_v57  ;;  %v3159_v1 = vpack.c.bf16 %v3480_v62, %v3479_v63  ;;  %v1355_v61 = vld [vmem:[#allocation6 + $0x28] sm:$0xff]  ;;  %v1354_v63 = vld [vmem:[#allocation6 + $0x20] sm:$0xff] }
 0x267   : > { %v3483_v10 = vpop.permute.xlu0 %3482  ;;  %v3488_v11 = vpop.permute.xlu1 %3487 }
 0x268   : > { %3156 = vmatprep.subr.bf16.mxu0 %v3155_v0  ;;  %v3485_v12 = vunpack.i.h.bf16 %v3483_v10  ;;  %v3484_v13 = vunpack.i.l.bf16 %v3483_v10  ;;  %v3490_v14 = vunpack.i.h.bf16 %v3488_v11  ;;  %v3489_v17 = vunpack.i.l.bf16 %v3488_v11 }
 0x269   : > { %3158 = vmatpush3.bf16.msra.mxu0 %v3155_v0  ;;  %3178 = vmatpush3.bf16.msra.mxu1 %v3175_v57 }
 0x26a   : > { %3160 = vmatprep.subr.bf16.mxu0 %v3159_v1  ;;  %v3183_v19 = vpack.c.bf16 %v3485_v12, %v3484_v13  ;;  %v3187_v20 = vpack.c.bf16 %v3490_v14, %v3489_v17  ;;  %v1357_v13 = vld [vmem:[#allocation6 + $0x38] sm:$0xff]  ;;  %v1356_v17 = vld [vmem:[#allocation6 + $0x30] sm:$0xff] }
 0x26b   : > { %v3493_v21 = vpop.permute.xlu0 %3492 }
 0x26c   : > { %2925 = vmatmul.mubr.msk.f32.vlgmr.msra.gmra.mrb[2].mxu1 %vm970_vm0, %v4305_v2  ;;  %v3495_v22 = vunpack.i.h.bf16 %v3493_v21  ;;  %v3494_v23 = vunpack.i.l.bf16 %v3493_v21 }
 0x26d   : > { %3162 = vmatpush3.bf16.msra.mxu0 %v3159_v1  ;;  %2927 = vmatprep.mubr.msk.f32.mxu1 %vm970_vm0, %v4307_v3 }
 0x26e   : > { %3180 = vmatprep.subr.bf16.mxu0 %v3179_v41  ;;  %v3191_v24 = vpack.c.bf16 %v3495_v22, %v3494_v23 }
 0x270   : > { %2928 = vmatmul.mubr.msk.f32.gmra.mrb[4].mxu1 %vm970_vm0, %v4313_v4  ;;  %2897 = vmatmul.mubr.msk.f32.vlgmr.msra.gmra.mrb[4].mxu0 %vm970_vm0, %v4305_v2 }
 0x271   : > { %2930 = vmatprep.mubr.msk.f32.mxu1 %vm970_vm0, %v4315_v5  ;;  %2899 = vmatprep.mubr.msk.f32.mxu0 %vm970_vm0, %v4307_v3 }
 0x272   : > { %3182 = vmatpush3.bf16.msra.mxu0 %v3179_v41 }
 0x273   : > { %3184 = vmatprep.subr.bf16.mxu0 %v3183_v19 }
 0x274   : > { %2931 = vmatmul.mubr.msk.f32.gmra.mrb[6].mxu1 %vm970_vm0, %v4323_v6  ;;  %2900 = vmatmul.mubr.msk.f32.gmra.mrb[6].mxu0 %vm970_vm0, %v4313_v4 }
 0x275   : > { %2933 = vmatprep.mubr.msk.f32.mxu1 %vm970_vm0, %v4327_v7  ;;  %2902 = vmatprep.mubr.msk.f32.mxu0 %vm970_vm0, %v4315_v5 }
 0x276   : > { %3186 = vmatpush3.bf16.msra.mxu0 %v3183_v19 }
 0x277   : > { %3188 = vmatprep.subr.bf16.mxu0 %v3187_v20 }
 0x278   : > { %2934 = vmatmul.mubr.msk.f32.gmra.mrb[8].mxu1 %vm970_vm0, %v4335_v8  ;;  %2903 = vmatmul.mubr.msk.f32.gmra.mrb[8].mxu0 %vm970_vm0, %v4323_v6 }
 0x279   : > { %2905 = vmatprep.mubr.msk.f32.mxu0 %vm970_vm0, %v4327_v7 }
 0x27a   : > { %3190 = vmatpush3.bf16.msra.mxu0 %v3187_v20 }
 0x27b   : > { %3192 = vmatprep.subr.bf16.mxu0 %v3191_v24 }
 0x27c   : > { %2906 = vmatmul.mubr.msk.f32.gmra.mrb[10].mxu0 %vm970_vm0, %v4335_v8 }
 0x27d   : > { %2952 = vmatprep.mubr.msk.f32.mxu0 %vm970_vm0, %v4291_v33 }
 0x27e   : > { %3194 = vmatpush3.bf16.msra.mxu0 %v3191_v24 }
 0x281   : > { %2953 = vmatmul.mubr.msk.f32.vlgmr.msra.gmra.mrb[12].mxu0 %vm970_vm0, %v4305_v2 }
 0x282   : > { %2955 = vmatprep.mubr.msk.f32.mxu0 %vm970_vm0, %v4307_v3 }
 0x285   : > { %2956 = vmatmul.mubr.msk.f32.gmra.mrb[14].mxu0 %vm970_vm0, %v4313_v4 }
 0x286   : > { %2958 = vmatprep.mubr.msk.f32.mxu0 %vm970_vm0, %v4315_v5 }
 0x289   : > { %2959 = vmatmul.mubr.msk.f32.gmra.mrb[16].mxu0 %vm970_vm0, %v4323_v6 }
 0x28a   : > { %2961 = vmatprep.mubr.msk.f32.mxu0 %vm970_vm0, %v4327_v7 }
 0x28d   : > { %2962 = vmatmul.mubr.msk.f32.gmra.mrb[18].mxu0 %vm970_vm0, %v4335_v8 }
 0x33f   : > { %v2926_v25 = vpop.f32.mrb[2].mxu1 }
 0x340   : > { %v1186_v26 = vpop.f32.mrb[3].mxu1 }
 0x341   : > { %v3195_v28 = vpack.c.bf16 %v2926_v25, %v1186_v26 }
 0x343   : > { %3197 = vmatprep.subr.msk.bf16.mxu1 %vm4365_vm2, %v3195_v28  ;;  %v2929_v29 = vpop.f32.mrb[4].mxu1  ;;  %v2898_v30 = vpop.f32.mrb[4].mxu0 }
 0x344   : > { %3200 = vmatpush3.bf16.xpose.msk.msra.mxu1 %vm4365_vm2, %v3195_v28  ;;  %v1196_v31 = vpop.f32.mrb[5].mxu1  ;;  %v1061_v32 = vpop.f32.mrb[5].mxu0 }
 0x345   : > { %v3201_v34 = vpack.c.bf16 %v2929_v29, %v1196_v31  ;;  %2980 = vmatprep.mubr.msk.f32.mxu1 %vm1358_vm1, %v1061_v32 }
 0x347   : > { %3203 = vmatprep.subr.msk.bf16.mxu1 %vm4365_vm2, %v3201_v34  ;;  %v2932_v35 = vpop.f32.mrb[6].mxu1  ;;  %v2901_v36 = vpop.f32.mrb[6].mxu0 }
 0x348   : > { %v1206_v37 = vpop.f32.mrb[7].mxu1  ;;  %v1071_v38 = vpop.f32.mrb[7].mxu0 }
 0x349   : > { %v3207_v39 = vpack.c.bf16 %v2932_v35, %v1206_v37 }
 0x34b   : > { %v2935_v40 = vpop.f32.mrb[8].mxu1  ;;  %v2904_v41 = vpop.f32.mrb[8].mxu0 }
 0x34c   : > { %3206 = vmatpush3.bf16.xpose.msk.msra.mxu1 %vm4365_vm2, %v3201_v34  ;;  %v1216_v42 = vpop.f32.mrb[9].mxu1  ;;  %v1081_v43 = vpop.f32.mrb[9].mxu0 }
 0x34d   : > { %3209 = vmatprep.subr.msk.bf16.mxu1 %vm4365_vm2, %v3207_v39  ;;  %v3213_v44 = vpack.c.bf16 %v2935_v40, %v1216_v42 }
 0x34f   : > { %v2907_v45 = vpop.f32.mrb[10].mxu0 }
 0x350   : > { %v1091_v46 = vpop.f32.mrb[11].mxu0 }
 0x354   : > { %3212 = vmatpush3.bf16.xpose.msk.msra.mxu1 %vm4365_vm2, %v3207_v39  ;;  %v2954_v26 = vpop.f32.mrb[12].mxu0 }
 0x355   : > { %3215 = vmatprep.subr.msk.bf16.mxu1 %vm4365_vm2, %v3213_v44  ;;  %v1311_v27 = vpop.f32.mrb[13].mxu0 }
 0x356   : > { %v3219_v28 = vpack.c.bf16 %v2954_v26, %v1311_v27 }
 0x358   : > { %v2957_v29 = vpop.f32.mrb[14].mxu0  ;;  %3220 = vmatprep.subr.bf16.mxu0 %v3219_v28 }
 0x359   : > { %3222 = vmatpush3.bf16.msra.mxu0 %v3219_v28 }
 0x35c   : > { %3218 = vmatpush3.bf16.xpose.msk.msra.mxu1 %vm4365_vm2, %v3213_v44 }
 0x363   : > { %2981 = vmatmul.mubr.msk.f32.vlgmr.msra.gmra.mrb[10].mxu1 %vm1358_vm1, %v2898_v30  ;;  %v1321_v30 = vpop.f32.mrb[15].mxu0 }
 0x364   : > { %2983 = vmatprep.mubr.msk.f32.mxu1 %vm1358_vm1, %v1071_v38  ;;  %v3223_v31 = vpack.c.bf16 %v2957_v29, %v1321_v30 }
 0x366   : > { %3224 = vmatprep.subr.bf16.mxu0 %v3223_v31 }
 0x367   : > { %2984 = vmatmul.mubr.msk.f32.gmra.mrb[12].mxu1 %vm1358_vm1, %v2901_v36  ;;  %3226 = vmatpush3.bf16.msra.mxu0 %v3223_v31 }
 0x368   : > { %2986 = vmatprep.mubr.msk.f32.mxu1 %vm1358_vm1, %v1081_v43 }
 0x36b   : > { %2987 = vmatmul.mubr.msk.f32.gmra.mrb[14].mxu1 %vm1358_vm1, %v2904_v41 }
 0x36c   : > { %2989 = vmatprep.mubr.msk.f32.mxu1 %vm1358_vm1, %v1091_v46 }
 0x36f   : > { %2990 = vmatmul.mubr.msk.f32.gmra.mrb[16].mxu1 %vm1358_vm1, %v2907_v45 }
 0x436   : > { %v2982_v49 = vpop.f32.mrb[10].mxu1 }
 0x437   : > { %v1479_v50 = vadd.f32 %v2982_v49, %v1351_v47  ;;  %v1473_v51 = vpop.f32.mrb[11].mxu1 }
 0x438   : > { %v1474_v52 = vadd.f32 %v1473_v51, %v1350_v48 }
 0x439   : > { %v1515_v54 = vsel %vm970_vm0, %v1479_v50, -inf }
 0x43a   : > { %1516 = vmax.xlane.f32.xlu0 %v1515_v54  ;;  %v2985_v56 = vpop.f32.mrb[12].mxu1  ;;  %v1512_v57 = vsel %vm970_vm0, %v1474_v52, -inf }
 0x43b   : > { %v1489_v58 = vadd.f32 %v2985_v56, %v1353_v53  ;;  %1513 = vmax.xlane.f32.xlu1 %v1512_v57  ;;  %v1483_v59 = vpop.f32.mrb[13].mxu1 }
 0x43c   : > { %v1484_v60 = vadd.f32 %v1483_v59, %v1352_v55 }
 0x43d   : > { %v1521_v62 = vsel %vm970_vm0, %v1489_v58, -inf }
 0x43e   : > { %v2988_v0 = vpop.f32.mrb[14].mxu1  ;;  %v1518_v1 = vsel %vm970_vm0, %v1484_v60, -inf }
 0x43f   : > { %v1499_v10 = vadd.f32 %v2988_v0, %v1355_v61  ;;  %1522 = vmax.xlane.f32.xlu1 %v1521_v62  ;;  %1519 = vmax.xlane.f32.xlu0 %v1518_v1  ;;  %v1493_v11 = vpop.f32.mrb[15].mxu1 }
 0x440   : > { %v1494_v12 = vadd.f32 %v1493_v11, %v1354_v63 }
 0x441   : > { %v1527_v14 = vsel %vm970_vm0, %v1499_v10, -inf }
 0x442   : > { %v2991_v19 = vpop.f32.mrb[16].mxu1  ;;  %v1524_v20 = vsel %vm970_vm0, %v1494_v12, -inf }
 0x443   : > { %v1509_v21 = vadd.f32 %v2991_v19, %v1357_v13  ;;  %1528 = vmax.xlane.f32.xlu1 %v1527_v14  ;;  %1525 = vmax.xlane.f32.xlu0 %v1524_v20  ;;  %v1503_v22 = vpop.f32.mrb[17].mxu1  ;;  %v2960_v20 = vpop.f32.mrb[16].mxu0 }
 0x444   : > { %v1504_v23 = vadd.f32 %v1503_v22, %v1356_v17 }
 0x445   : > { %v1533_v24 = vsel %vm970_vm0, %v1509_v21, -inf }
 0x446   : > { %v1530_v25 = vsel %vm970_vm0, %v1504_v23, -inf }
 0x447   : > { %1534 = vmax.xlane.f32.xlu1 %v1533_v24  ;;  %1531 = vmax.xlane.f32.xlu0 %v1530_v25 }
 0x4c7   : > { %v1517_v32 = vpop.xlane.xlu0 %1516 }
 0x4c8   : > { %v1537_v34 = vsub.f32 %v1479_v50, %v1517_v32  ;;  %v1514_v35 = vpop.xlane.xlu1 %1513 }
 0x4c9   : > { %v1536_v36 = vsub.f32 %v1474_v52, %v1514_v35 }
 0x4ca   : > { %v1546_v37 = vmul.f32 1.442695, %v1537_v34 }
 0x4cb   : > { %v1544_v38 = vmul.f32 1.442695, %v1536_v36 }
 0x4cc   : > { %3511 = vpow2.f32 %v1546_v37  ;;  %v1523_v39 = vpop.xlane.xlu1 %1522  ;;  %v1520_v40 = vpop.xlane.xlu0 %1519 }
 0x4cd   : > { %3513 = vpow2.f32 %v1544_v38  ;;  %v1539_v41 = vsub.f32 %v1489_v58, %v1523_v39  ;;  %v1538_v42 = vsub.f32 %v1484_v60, %v1520_v40 }
 0x4cf   : > { %v1550_v43 = vmul.f32 1.442695, %v1539_v41  ;;  %v1548_v44 = vmul.f32 1.442695, %v1538_v42 }
 0x4d0   : > { %v1529_v45 = vpop.xlane.xlu1 %1528  ;;  %v1526_v46 = vpop.xlane.xlu0 %1525 }
 0x4d1   : > { %3515 = vpow2.f32 %v1550_v43  ;;  %v1541_v47 = vsub.f32 %v1499_v10, %v1529_v45  ;;  %v1540_v48 = vsub.f32 %v1494_v12, %v1526_v46 }
 0x4d2   : > { %3517 = vpow2.f32 %v1548_v44 }
 0x4d3   : > { %v1554_v49 = vmul.f32 1.442695, %v1541_v47  ;;  %v1552_v50 = vmul.f32 1.442695, %v1540_v48 }
 0x4d4   : > { %v1535_v51 = vpop.xlane.xlu1 %1534  ;;  %v1532_v52 = vpop.xlane.xlu0 %1531 }
 0x4d5   : > { %3519 = vpow2.f32 %v1554_v49  ;;  %v1543_v53 = vsub.f32 %v1509_v21, %v1535_v51  ;;  %v1542_v54 = vsub.f32 %v1504_v23, %v1532_v52  ;;  %v1331_v21 = vpop.f32.mrb[17].mxu0 }
 0x4d6   : > { %v3512_v55 = vpop.eup %3511  ;;  %3521 = vpow2.f32 %v1552_v50  ;;  %v3227_v22 = vpack.c.bf16 %v2960_v20, %v1331_v21  ;;  %v2963_v23 = vpop.f32.mrb[18].mxu0  ;;  %v1964_v20 = vld [vmem:[%s4182_s26 + $0x30] sm:$0xff]  ;;  %v1965_v21 = vld [vmem:[%s4182_s26 + $0x38] sm:$0xff] }
 0x4d7   : > { %v3514_v56 = vpop.eup %3513  ;;  %v1558_v57 = vmul.f32 1.442695, %v1543_v53  ;;  %v1556_v58 = vmul.f32 1.442695, %v1542_v54  ;;  %v1563_v59 = vsel %vm970_vm0, %v3512_v55, 0.0  ;;  %v1341_v24 = vpop.f32.mrb[19].mxu0 }
 0x4d8   : > { %1564 = vadd.xlane.f32.xlu1 %v1563_v59  ;;  %v1560_v60 = vsel %vm970_vm0, %v3514_v56, 0.0  ;;  %3228 = vmatprep.subr.bf16.mxu0 %v3227_v22  ;;  %v3231_v25 = vpack.c.bf16 %v2963_v23, %v1341_v24  ;;  %v1966_v23 = vld [vmem:[%s4182_s26 + $0x40] sm:$0xff]  ;;  %v1967_v24 = vld [vmem:[%s4182_s26 + $0x48] sm:$0xff] }
 0x4d9   : > { %3523 = vpow2.f32 %v1558_v57  ;;  %1561 = vadd.xlane.f32.xlu0 %v1560_v60  ;;  %3230 = vmatpush3.bf16.msra.mxu0 %v3227_v22  ;;  %v3263_v22 = vpack.c.bf16 %v1965_v21, %v1964_v20  ;;  %v2076_v20 = vld [vmem:[%s4213_s10 + $0x90] sm:$0xff]  ;;  %v2079_v21 = vld [vmem:[%s4213_s10 + $0xa8] sm:$0xff] }
 0x4da   : > { %3525 = vpow2.f32 %v1556_v58  ;;  %3232 = vmatprep.subr.bf16.mxu0 %v3231_v25 }
 0x4db   : > { %v4403_v61 = vpop.eup %3515 }
 0x4dc   : > { %v4405_v62 = vpop.eup %3517  ;;  %v1569_v63 = vsel %vm970_vm0, %v4403_v61, 0.0 }
 0x4dd   : > { %1570 = vadd.xlane.f32.xlu1 %v1569_v63  ;;  %v1566_v0 = vsel %vm970_vm0, %v4405_v62, 0.0  ;;  %3234 = vmatpush3.bf16.msra.mxu0 %v3231_v25  ;;  %v3267_v25 = vpack.c.bf16 %v1967_v24, %v1966_v23 }
 0x4de   : > { %1567 = vadd.xlane.f32.xlu0 %v1566_v0  ;;  %v1958_v0 = vld [vmem:[%s4182_s26] sm:$0xff] }
 0x4df   : > { %v4411_v1 = vpop.eup %3519 }
 0x4e0   : > { %v4413_v10 = vpop.eup %3521  ;;  %v1575_v11 = vsel %vm970_vm0, %v4411_v1, 0.0 }
 0x4e1   : > { %1576 = vadd.xlane.f32.xlu1 %v1575_v11  ;;  %v1572_v12 = vsel %vm970_vm0, %v4413_v10, 0.0 }
 0x4e2   : > { %1573 = vadd.xlane.f32.xlu0 %v1572_v12  ;;  %v1961_v12 = vld [vmem:[%s4182_s26 + $0x18] sm:$0xff] }
 0x4e3   : > { %v4419_v13 = vpop.eup %3523 }
 0x4e4   : > { %v4421_v14 = vpop.eup %3525  ;;  %v1581_v17 = vsel %vm970_vm0, %v4419_v13, 0.0 }
 0x4e5   : > { %1582 = vadd.xlane.f32.xlu1 %v1581_v17  ;;  %v1578_v19 = vsel %vm970_vm0, %v4421_v14, 0.0  ;;  %v1963_v17 = vld [vmem:[%s4182_s26 + $0x28] sm:$0xff] }
 0x4e6   : > { %1579 = vadd.xlane.f32.xlu0 %v1578_v19 }
 0x513   : > { %1766 = vxpose.xlu0.b32.start [1/8] (short) (narrow) %v4291_v33, 64 }
 0x517   : > { %1767 = vxpose.xlu0.b32.cont [2/8] (short) (narrow) %v4305_v2, 64 }
 0x51b   : > { %1768 = vxpose.xlu0.b32.cont [3/8] (short) (narrow) %v4307_v3, 64 }
 0x51f   : > { %1769 = vxpose.xlu0.b32.cont [4/8] (short) (narrow) %v4313_v4, 64 }
 0x523   : > { %1770 = vxpose.xlu0.b32.cont [5/8] (short) (narrow) %v4315_v5, 64 }
 0x527   : > { %1771 = vxpose.xlu0.b32.cont [6/8] (short) (narrow) %v4323_v6, 64 }
 0x52b   : > { %1772 = vxpose.xlu0.b32.cont [7/8] (short) (narrow) %v4327_v7, 64 }
 0x52f   : > { %1773 = vxpose.xlu0.b32.end [8/8] (short) (narrow) %v4335_v8, 64 }
 0x565   : > { %v1565_v26 = vpop.xlane.xlu1 %1564 }
 0x566   : > { %3527 = vrcp.f32 %v1565_v26  ;;  %v1562_v27 = vpop.xlane.xlu0 %1561  ;;  %v1968_v26 = vld [vmem:[%s4182_s26 + $0x50] sm:$0xff] }
 0x567   : > { %3529 = vrcp.f32 %v1562_v27  ;;  %v1969_v27 = vld [vmem:[%s4182_s26 + $0x58] sm:$0xff] }
 0x56a   : > { %v1571_v28 = vpop.xlane.xlu1 %1570 }
 0x56b   : > { %3531 = vrcp.f32 %v1571_v28  ;;  %v1568_v33 = vpop.xlane.xlu0 %1567  ;;  %v3271_v28 = vpack.c.bf16 %v1969_v27, %v1968_v26  ;;  %v2080_v26 = vld [vmem:[%s4213_s10 + $0xb0] sm:$0xff]  ;;  %v2083_v27 = vld [vmem:[%s4213_s10 + $0xc8] sm:$0xff] }
 0x56c   : > { %3533 = vrcp.f32 %v1568_v33  ;;  %v1970_v33 = vld [vmem:[%s4182_s26 + $0x60] sm:$0xff] }
 0x56e   : > { %v1577_v2 = vpop.xlane.xlu1 %1576 }
 0x56f   : > { %3535 = vrcp.f32 %v1577_v2  ;;  %v1574_v3 = vpop.xlane.xlu0 %1573  ;;  %v1971_v2 = vld [vmem:[%s4182_s26 + $0x68] sm:$0xff] }
 0x570   : > { %v3528_v4 = vpop.eup %3527  ;;  %3537 = vrcp.f32 %v1574_v3  ;;  %v3275_v3 = vpack.c.bf16 %v1971_v2, %v1970_v33 }
 0x571   : > { %v3530_v5 = vpop.eup %3529  ;;  %v1593_v6 = vmul.f32 %v3528_v4, %v3512_v55 }
 0x572   : > { %v1583_v7 = vpop.xlane.xlu1 %1582  ;;  %v1592_v29 = vmul.f32 %v3530_v5, %v3514_v56  ;;  %v1972_v5 = vld [vmem:[%s4182_s26 + $0x70] sm:$0xff] }
 0x573   : > { %3539 = vrcp.f32 %v1583_v7  ;;  %v1580_v8 = vpop.xlane.xlu0 %1579  ;;  %1603 = vrot.lane.b32.xlu0 %v1593_v6, %s3815_s11 }
 0x574   : > { %3541 = vrcp.f32 %v1580_v8  ;;  %1601 = vst.msk [vmem:[%s4211_s15] sm:$0xff] %vm1600_vm3, %v1592_v29  ;;  %3008 = vmatprep.mubr.msk.f32.mxu0 %vm970_vm0, %v1592_v29 }
 0x575   : > { %v3532_v30 = vpop.eup %3531  ;;  %3009 = vmatmul.mubr.msk.f32.vlgmr.msra.gmra.mrb[20].mxu0 %vm970_vm0, %v1593_v6  ;;  %v1973_v6 = vld [vmem:[%s4182_s26 + $0x78] sm:$0xff] }
 0x576   : > { %v3534_v31 = vpop.eup %3533  ;;  %v4440_v32 = vmul.f32 %v3532_v30, %v4403_v61  ;;  %v3279_v29 = vpack.c.bf16 %v1973_v6, %v1972_v5  ;;  %v2084_v5 = vld [vmem:[%s4213_s10 + $0xd0] sm:$0xff] }
 0x577   : > { %v4443_v34 = vmul.f32 %v3534_v31, %v4405_v62 }
 0x579   : > { %v3536_v35 = vpop.eup %3535  ;;  %3011 = vmatprep.mubr.msk.f32.mxu0 %vm970_vm0, %v4443_v34 }
 0x57a   : > { %v3538_v36 = vpop.eup %3537  ;;  %3012 = vmatmul.mubr.msk.f32.gmra.mrb[22].mxu0 %vm970_vm0, %v4440_v32  ;;  %v4450_v37 = vmul.f32 %v3536_v35, %v4411_v1  ;;  %v1959_v1 = vld [vmem:[%s4182_s26 + $0x8] sm:$0xff]  ;;  %v2059_v35 = vld [vmem:[%s4213_s10 + $0x8] sm:$0xff] }
 0x57b   : > { %v4453_v38 = vmul.f32 %v3538_v36, %v4413_v10  ;;  %v1960_v10 = vld [vmem:[%s4182_s26 + $0x10] sm:$0xff]  ;;  %v3251_v11 = vpack.c.bf16 %v1959_v1, %v1958_v0  ;;  %v2061_v36 = vld [vmem:[%s4213_s10 + $0x18] sm:$0xff] }
 0x57d   : > { %v3540_v39 = vpop.eup %3539  ;;  %3014 = vmatprep.mubr.msk.f32.mxu0 %vm970_vm0, %v4453_v38  ;;  %3252 = vmatprep.subr.bf16.mxu1 %v3251_v11 }
 0x57e   : > { %v3542_v40 = vpop.eup %3541  ;;  %3015 = vmatmul.mubr.msk.f32.gmra.mrb[24].mxu0 %vm970_vm0, %v4450_v37  ;;  %v4460_v41 = vmul.f32 %v3540_v39, %v4419_v13  ;;  %v3255_v13 = vpack.c.bf16 %v1961_v12, %v1960_v10  ;;  %3254 = vmatpush3.bf16.msra.mxu1 %v3251_v11  ;;  %v2058_v39 = vld [vmem:[%s4213_s10] sm:$0xff]  ;;  %v2072_v11 = vld [vmem:[%s4213_s10 + $0x70] sm:$0xff]  ;;  %v2075_v12 = vld [vmem:[%s4213_s10 + $0x88] sm:$0xff] }
 0x57f   : > { %v4463_v42 = vmul.f32 %v3542_v40, %v4421_v14  ;;  %v1962_v14 = vld [vmem:[%s4182_s26 + $0x20] sm:$0xff]  ;;  %v2070_v10 = vld [vmem:[%s4213_s10 + $0x60] sm:$0xff] }
 0x580   : > { %3256 = vmatprep.subr.bf16.mxu1 %v3255_v13  ;;  %v3259_v19 = vpack.c.bf16 %v1963_v17, %v1962_v14  ;;  %v3297_v14 = vpack.c.bf16 %v2072_v11, %v2070_v10  ;;  %v2204_v10 = vld [vmem:[%s4215_s20 + $0xa8] sm:$0xff] }
 0x581   : > { %3017 = vmatprep.mubr.msk.f32.mxu0 %vm970_vm0, %v4463_v42 }
 0x582   : > { %3018 = vmatmul.mubr.msk.f32.gmra.mrb[26].mxu0 %vm970_vm0, %v4460_v41  ;;  %3258 = vmatpush3.bf16.msra.mxu1 %v3255_v13  ;;  %v2077_v13 = vld [vmem:[%s4213_s10 + $0x98] sm:$0xff] }
 0x583   : > { %3260 = vmatprep.subr.bf16.mxu1 %v3259_v19  ;;  %v3299_v17 = vpack.c.bf16 %v2077_v13, %v2075_v12  ;;  %v2187_v13 = vld [vmem:[%s4215_s20 + $0x20] sm:$0xff] }
 0x586   : > { %3262 = vmatpush3.bf16.msra.mxu1 %v3259_v19  ;;  %v2074_v19 = vld [vmem:[%s4213_s10 + $0x80] sm:$0xff] }
 0x587   : > { %3264 = vmatprep.subr.bf16.mxu1 %v3263_v22  ;;  %v3301_v23 = vpack.c.bf16 %v2076_v20, %v2074_v19  ;;  %v2206_v19 = vld [vmem:[%s4215_s20 + $0xb8] sm:$0xff] }
 0x58a   : > { %3266 = vmatpush3.bf16.msra.mxu1 %v3263_v22  ;;  %v2081_v22 = vld [vmem:[%s4213_s10 + $0xb8] sm:$0xff] }
 0x58b   : > { %3268 = vmatprep.subr.bf16.mxu1 %v3267_v25  ;;  %v3303_v24 = vpack.c.bf16 %v2081_v22, %v2079_v21  ;;  %v2189_v22 = vld [vmem:[%s4215_s20 + $0x30] sm:$0xff] }
 0x58e   : > { %3270 = vmatpush3.bf16.msra.mxu1 %v3267_v25  ;;  %v2078_v25 = vld [vmem:[%s4213_s10 + $0xa0] sm:$0xff] }
 0x58f   : > { %3272 = vmatprep.subr.bf16.mxu1 %v3271_v28  ;;  %v3305_v33 = vpack.c.bf16 %v2080_v26, %v2078_v25  ;;  %v2208_v25 = vld [vmem:[%s4215_s20 + $0xc8] sm:$0xff] }
 0x592   : > { %3274 = vmatpush3.bf16.msra.mxu1 %v3271_v28  ;;  %v2085_v28 = vld [vmem:[%s4213_s10 + $0xd8] sm:$0xff] }
 0x593   : > { %v1782_v43 = vpop.trf.xlu0  ;;  %3276 = vmatprep.subr.bf16.mxu1 %v3275_v3  ;;  %v3307_v2 = vpack.c.bf16 %v2085_v28, %v2083_v27  ;;  %v2191_v28 = vld [vmem:[%s4215_s20 + $0x40] sm:$0xff] }
 0x594   : > { %3036 = vmatprep.mubr.msk.f32.mxu0 %vm970_vm0, %v1782_v43  ;;  %v3283_v43 = vpack.c.bf16 %v2061_v36, %v2059_v35 }
 0x596   : > { %3278 = vmatpush3.bf16.msra.mxu1 %v3275_v3  ;;  %v2082_v3 = vld [vmem:[%s4213_s10 + $0xc0] sm:$0xff] }
 0x597   : > { %v1783_v44 = vpop.trf.xlu0  ;;  %3280 = vmatprep.subr.bf16.mxu1 %v3279_v29  ;;  %v3309_v6 = vpack.c.bf16 %v2084_v5, %v2082_v3  ;;  %v2210_v3 = vld [vmem:[%s4215_s20 + $0xd8] sm:$0xff] }
 0x59a   : > { %3282 = vmatpush3.bf16.msra.mxu1 %v3279_v29 }
 0x59b   : > { %v1784_v45 = vpop.trf.xlu0 }
 0x59f   : > { %v1785_v46 = vpop.trf.xlu0 }
 0x5a3   : > { %v1786_v47 = vpop.trf.xlu0 }
 0x5a7   : > { %v1787_v48 = vpop.trf.xlu0 }
 0x5ab   : > { %v1788_v49 = vpop.trf.xlu0 }
 0x5af   : > { %v1789_v50 = vpop.trf.xlu0 }
 0x5e5   : > { %v1604_v51 = vpop.permute.xlu0 %1603 }
 0x5e6   : > { %2640 = vst.msk [vmem:[%s4211_s15 + $0x8] sm:$0xff] %vm1600_vm3, %v1604_v51  ;;  %v2064_v51 = vld [vmem:[%s4213_s10 + $0x30] sm:$0xff] }
 0x648   : > { %v3010_v52 = vpop.f32.mrb[20].mxu0 }
 0x649   : > { %v1727_v53 = vpop.f32.mrb[21].mxu0 }
 0x64a   : > { %v3235_v54 = vpack.c.bf16 %v3010_v52, %v1727_v53  ;;  %v2067_v52 = vld [vmem:[%s4213_s10 + $0x48] sm:$0xff] }
 0x64c   : > { %3236 = vmatprep.subr.bf16.mxu0 %v3235_v54 }
 0x64d   : > { %v3013_v55 = vpop.f32.mrb[22].mxu0  ;;  %3238 = vmatpush3.bf16.msra.mxu0 %v3235_v54  ;;  %v2069_v54 = vld [vmem:[%s4213_s10 + $0x58] sm:$0xff] }
 0x64e   : > { %v1737_v56 = vpop.f32.mrb[23].mxu0 }
 0x64f   : > { %v3239_v57 = vpack.c.bf16 %v3013_v55, %v1737_v56 }
 0x651   : > { %v3016_v58 = vpop.f32.mrb[24].mxu0  ;;  %3240 = vmatprep.subr.bf16.mxu0 %v3239_v57 }
 0x652   : > { %v1747_v59 = vpop.f32.mrb[25].mxu0  ;;  %3242 = vmatpush3.bf16.msra.mxu0 %v3239_v57  ;;  %v3291_v57 = vpack.c.bf16 %v2069_v54, %v2067_v52  ;;  %v2086_v52 = vld [vmem:[%s4213_s10 + $0xe0] sm:$0xff] }
 0x653   : > { %v3243_v60 = vpack.c.bf16 %v3016_v58, %v1747_v59  ;;  %v2066_v58 = vld [vmem:[%s4213_s10 + $0x40] sm:$0xff]  ;;  %v2068_v59 = vld [vmem:[%s4213_s10 + $0x50] sm:$0xff] }
 0x654   : > { %v3293_v0 = vpack.c.bf16 %v2068_v59, %v2066_v58  ;;  %v2199_v54 = vld [vmem:[%s4215_s20 + $0x80] sm:$0xff]  ;;  %v2184_v58 = vld [vmem:[%s4215_s20 + $0x8] sm:$0xff]  ;;  %v2201_v59 = vld [vmem:[%s4215_s20 + $0x90] sm:$0xff] }
 0x655   : > { %v3019_v61 = vpop.f32.mrb[26].mxu0  ;;  %3244 = vmatprep.subr.bf16.mxu0 %v3243_v60 }
 0x656   : > { %v1757_v62 = vpop.f32.mrb[27].mxu0  ;;  %3246 = vmatpush3.bf16.msra.mxu0 %v3243_v60 }
 0x657   : > { %v3247_v63 = vpack.c.bf16 %v3019_v61, %v1757_v62  ;;  %v2071_v61 = vld [vmem:[%s4213_s10 + $0x68] sm:$0xff]  ;;  %v2073_v62 = vld [vmem:[%s4213_s10 + $0x78] sm:$0xff] }
 0x658   : > { %v3295_v1 = vpack.c.bf16 %v2073_v62, %v2071_v61 }
 0x659   : > { %3248 = vmatprep.subr.bf16.mxu0 %v3247_v63 }
 0x65a   : > { %3250 = vmatpush3.bf16.msra.mxu0 %v3247_v63 }
 0x65b   : > { %3284 = vmatprep.subr.bf16.mxu0 %v3283_v43 }
 0x65d   : > { %3037 = vmatmul.mubr.msk.f32.vlgmr.msra.gmra.mrb[28].mxu0 %vm970_vm0, %v1783_v44  ;;  %v2060_v44 = vld [vmem:[%s4213_s10 + $0x10] sm:$0xff] }
 0x65e   : > { %3039 = vmatprep.mubr.msk.f32.mxu0 %vm970_vm0, %v1784_v45  ;;  %v2063_v45 = vld [vmem:[%s4213_s10 + $0x28] sm:$0xff] }
 0x661   : > { %3040 = vmatmul.mubr.msk.f32.gmra.mrb[30].mxu0 %vm970_vm0, %v1785_v46  ;;  %v2065_v46 = vld [vmem:[%s4213_s10 + $0x38] sm:$0xff] }
 0x662   : > { %3042 = vmatprep.mubr.msk.f32.mxu0 %vm970_vm0, %v1786_v47 }
 0x665   : > { %3043 = vmatmul.mubr.msk.f32.gmra.mrb[32].mxu0 %vm970_vm0, %v1787_v48  ;;  %v3285_v48 = vpack.c.bf16 %v2060_v44, %v2058_v39 }
 0x666   : > { %3045 = vmatprep.mubr.msk.f32.mxu0 %vm970_vm0, %v1788_v49  ;;  %v3287_v49 = vpack.c.bf16 %v2065_v46, %v2063_v45 }
 0x667   : > { %3286 = vmatpush1.bf16.msra.mxu0 %v3285_v48 }
 0x668   : > { %3288 = vmatprep.subr.bf16.mxu0 %v3287_v49 }
 0x669   : > { %3046 = vmatmul.mubr.msk.f32.gmra.mrb[34].mxu0 %vm970_vm0, %v1789_v50  ;;  %v2062_v50 = vld [vmem:[%s4213_s10 + $0x20] sm:$0xff] }
 0x66a   : > { %2166 = vmatprep.mubr.f32.mxu0 %v3811_v9  ;;  %v3289_v55 = vpack.c.bf16 %v2064_v51, %v2062_v50  ;;  %v2089_v50 = vld [vmem:[%s4213_s10 + $0xf8] sm:$0xff] }
 0x66c   : > { %3290 = vmatpush1.bf16.msra.mxu0 %v3289_v55  ;;  %v2200_v55 = vld [vmem:[%s4215_s20 + $0x88] sm:$0xff] }
 0x66d   : > { %3292 = vmatprep.subr.bf16.mxu0 %v3291_v57  ;;  %v3315_v57 = vpack.c.bf16 %v2200_v55, %v2199_v54  ;;  %v2197_v54 = vld [vmem:[%s4215_s20 + $0x70] sm:$0xff]  ;;  %v2198_v55 = vld [vmem:[%s4215_s20 + $0x78] sm:$0xff] }
 0x66f   : > { %3316 = vmatprep.subr.bf16.mxu1 %v3315_v57  ;;  %v2090_v57 = vld [vmem:[%s4197_s24] sm:$0x3] }
 0x670   : > { %3294 = vmatpush1.bf16.msra.mxu0 %v3293_v0  ;;  %v2186_v0 = vld [vmem:[%s4215_s20 + $0x18] sm:$0xff] }
 0x671   : > { %3296 = vmatprep.subr.bf16.mxu0 %v3295_v1  ;;  %v2203_v1 = vld [vmem:[%s4215_s20 + $0xa0] sm:$0xff] }
 0x672   : > { %v3323_v12 = vpack.c.bf16 %v2204_v10, %v2203_v1 }
 0x674   : > { %3298 = vmatpush1.bf16.msra.mxu0 %v3297_v14  ;;  %v2188_v14 = vld [vmem:[%s4215_s20 + $0x28] sm:$0xff] }
 0x675   : > { %3300 = vmatprep.subr.bf16.mxu0 %v3299_v17  ;;  %v2205_v17 = vld [vmem:[%s4215_s20 + $0xb0] sm:$0xff]  ;;  %v3325_v20 = vpack.c.bf16 %v2188_v14, %v2187_v13 }
 0x676   : > { %v3327_v21 = vpack.c.bf16 %v2206_v19, %v2205_v17 }
 0x678   : > { %3302 = vmatpush1.bf16.msra.mxu0 %v3301_v23  ;;  %v2190_v23 = vld [vmem:[%s4215_s20 + $0x38] sm:$0xff] }
 0x679   : > { %3304 = vmatprep.subr.bf16.mxu0 %v3303_v24  ;;  %v2207_v24 = vld [vmem:[%s4215_s20 + $0xc0] sm:$0xff]  ;;  %v3329_v26 = vpack.c.bf16 %v2190_v23, %v2189_v22 }
 0x67a   : > { %v3331_v27 = vpack.c.bf16 %v2208_v25, %v2207_v24 }
 0x67c   : > { %3306 = vmatpush1.bf16.msra.mxu0 %v3305_v33  ;;  %v2192_v33 = vld [vmem:[%s4215_s20 + $0x48] sm:$0xff] }
 0x67d   : > { %3308 = vmatprep.subr.bf16.mxu0 %v3307_v2  ;;  %v2209_v2 = vld [vmem:[%s4215_s20 + $0xd0] sm:$0xff]  ;;  %v3333_v5 = vpack.c.bf16 %v2192_v33, %v2191_v28 }
 0x680   : > { %3310 = vmatpush1.bf16.msra.mxu0 %v3309_v6  ;;  %v3335_v6 = vpack.c.bf16 %v2210_v3, %v2209_v2 }
 0x730   : > { %v4494_v4 = vpop.f32.mrb[28].mxu0 }
 0x731   : > { %v4498_v7 = vpop.f32.mrb[29].mxu0 }
 0x734   : > { %v3041_v8 = vpop.f32.mrb[30].mxu0 }
 0x735   : > { %v1898_v30 = vpop.f32.mrb[31].mxu0 }
 0x736   : > { %v3496_v31 = vpack.i.bf16 %v3041_v8, %v1898_v30 }
 0x738   : > { %3497 = vrot.lane.b32.xlu1 %v3496_v31, %s3812_s7  ;;  %v3044_v40 = vpop.f32.mrb[32].mxu0 }
 0x739   : > { %v1908_v47 = vpop.f32.mrb[33].mxu0 }
 0x73a   : > { %v3501_v53 = vpack.i.bf16 %v3044_v40, %v1908_v47 }
 0x73c   : > { %3502 = vrot.lane.b32.xlu1 %v3501_v53, %s3814_s8  ;;  %v3047_v56 = vpop.f32.mrb[34].mxu0 }
 0x73d   : > { %v1918_v60 = vpop.f32.mrb[35].mxu0 }
 0x73e   : > { %v3506_v63 = vpack.i.bf16 %v3047_v56, %v1918_v60  ;;  %v2183_v56 = vld [vmem:[%s4215_s20] sm:$0xff]  ;;  %v2202_v60 = vld [vmem:[%s4215_s20 + $0x98] sm:$0xff] }
 0x73f   : > { %v3317_v61 = vpack.c.bf16 %v2184_v58, %v2183_v56  ;;  %v3319_v62 = vpack.c.bf16 %v2202_v60, %v2201_v59  ;;  %v3345_v56 = vpack.c.bf16 %v2198_v55, %v2197_v54  ;;  %v2099_v58 = vrot.slane %v2090_v57, %v781_v18 }
 0x740   : > { %3507 = vrot.lane.b32.xlu1 %v3506_v63, %s3813_s14  ;;  %v2185_v63 = vld [vmem:[%s4215_s20 + $0x10] sm:$0xff] }
 0x741   : > { %v3321_v11 = vpack.c.bf16 %v2186_v0, %v2185_v63 }
 0x7aa   : > { %v3498_v29 = vpop.permute.xlu1 %3497 }
 0x7ab   : > { %v3500_v30 = vunpack.i.h.bf16 %v3498_v29  ;;  %v3499_v31 = vunpack.i.l.bf16 %v3498_v29  ;;  %v2193_v29 = vld [vmem:[%s4215_s20 + $0x50] sm:$0xff] }
 0x7ad   : > { %v1952_v40 = vsel %vm1358_vm1, %v4494_v4, %v3500_v30  ;;  %v1951_v45 = vsel %vm1358_vm1, %v4498_v7, %v3499_v31  ;;  %v2087_v4 = vld [vmem:[%s4213_s10 + $0xe8] sm:$0xff]  ;;  %v2088_v7 = vld [vmem:[%s4213_s10 + $0xf0] sm:$0xff]  ;;  %v2211_v30 = vld [vmem:[%s4215_s20 + $0xe0] sm:$0xff]  ;;  %s3820_s10 = smov 72  }
 0x7ae   : > { %v3503_v8 = vpop.permute.xlu1 %3502  ;;  %v3311_v51 = vpack.c.bf16 %v2089_v50, %v2087_v4  ;;  %v3313_v53 = vpack.c.bf16 %v2088_v7, %v2086_v52  ;;  %v2212_v31 = vld [vmem:[%s4215_s20 + $0xe8] sm:$0xff]  ;;  %v2195_v4 = vld [vmem:[%s4215_s20 + $0x60] sm:$0xff]  ;;  %v2213_v52 = vld [vmem:[%s4215_s20 + $0xf0] sm:$0xff] }
 0x7af   : > { %v3505_v35 = vunpack.i.h.bf16 %v3503_v8  ;;  %v3504_v36 = vunpack.i.l.bf16 %v3503_v8  ;;  %v2194_v8 = vld [vmem:[%s4215_s20 + $0x58] sm:$0xff]  ;;  %v2196_v50 = vld [vmem:[%s4215_s20 + $0x68] sm:$0xff] }
 0x7b0   : > { %3312 = vmatprep.subr.bf16.mxu0 %v3311_v51  ;;  %v3341_v51 = vpack.c.bf16 %v2196_v50, %v2195_v4  ;;  %v2214_v7 = vld [vmem:[%s4215_s20 + $0xf8] sm:$0xff] }
 0x7b1   : > { %v1954_v46 = vsel %vm970_vm0, %v1952_v40, %v3505_v35  ;;  %v1953_v47 = vsel %vm970_vm0, %v1951_v45, %v3504_v36  ;;  %3314 = vmatpush1.bf16.msra.mxu0 %v3313_v53  ;;  %v3337_v35 = vpack.c.bf16 %v2194_v8, %v2193_v29  ;;  %v3339_v36 = vpack.c.bf16 %v2212_v31, %v2211_v30 }
 0x7b2   : > { %v3508_v39 = vpop.permute.xlu1 %3507  ;;  %v3343_v53 = vpack.c.bf16 %v2214_v7, %v2213_v52 }
 0x7b3   : > { %v3510_v43 = vunpack.i.h.bf16 %v3508_v39  ;;  %v3509_v44 = vunpack.i.l.bf16 %v3508_v39  ;;  %v2663_v39 = vld [vmem:[%s4735_s19] ss:$0 sm:$0xff] }
 0x7b5   : > { %v1956_v48 = vsel %vm1955_vm4, %v1953_v47, %v3509_v44  ;;  %v1957_v49 = vsel %vm1955_vm4, %v1954_v46, %v3510_v43  ;;  %v3547_v46 = vld [vmem:[#allocation2] sm:$0xff] }
 0x7b6   : > { %3080 = vmatprep.mubr.f32.mxu1 %v1956_v48  ;;  %v3548_v48 = vld [vmem:[#allocation2 + $0x8] sm:$0xff] }
 0x7b7   : > { %3081 = vmatmul.mubr.f32.vlgmr.msra.gmra.mrb[18].mxu1 %v1957_v49 }
 0x7b8   : > { %3318 = vmatpush3.bf16.msra.mxu1 %v3317_v61 }
 0x7b9   : > { %3320 = vmatprep.subr.bf16.mxu1 %v3319_v62 }
 0x7bc   : > { %3322 = vmatpush3.bf16.msra.mxu1 %v3321_v11 }
 0x7bd   : > { %3324 = vmatprep.subr.bf16.mxu1 %v3323_v12 }
 0x7c0   : > { %3326 = vmatpush3.bf16.msra.mxu1 %v3325_v20 }
 0x7c1   : > { %3328 = vmatprep.subr.bf16.mxu1 %v3327_v21 }
 0x7c4   : > { %3330 = vmatpush3.bf16.msra.mxu1 %v3329_v26 }
 0x7c5   : > { %3332 = vmatprep.subr.bf16.mxu1 %v3331_v27 }
 0x7c8   : > { %3334 = vmatpush3.bf16.msra.mxu1 %v3333_v5 }
 0x7c9   : > { %3336 = vmatprep.subr.bf16.mxu1 %v3335_v6 }
 0x7cc   : > { %3338 = vmatpush3.bf16.msra.mxu1 %v3337_v35 }
 0x7cd   : > { %3340 = vmatprep.subr.bf16.mxu1 %v3339_v36 }
 0x7d0   : > { %3342 = vmatpush3.bf16.msra.mxu1 %v3341_v51 }
 0x7d1   : > { %3344 = vmatprep.subr.bf16.mxu1 %v3343_v53 }
 0x7d4   : > { %3346 = vmatpush3.bf16.msra.mxu1 %v3345_v56 }
 0x88a   : > { %v3082_v40 = vpop.f32.mrb[18].mxu1 }
 0x88b   : > { %v2047_v43 = vpop.f32.mrb[19].mxu1  ;;  %v2053_v45 = vadd.f32 %v3082_v40, %v2663_v39 }
 0x88c   : > { %v2048_v44 = vadd.f32 %v2663_v39, %v2047_v43  ;;  %v2665_v43 = vld [vmem:[%s709_s25] ss:$0 sm:$0xff] }
 0x88d   : > { %v2057_v49 = vadd.f32 %v3548_v48, %v2053_v45 }
 0x88e   : > { %v2056_v47 = vadd.f32 %v3547_v46, %v2048_v44 }
 0x890   : > { %2167 = vmatmul.mubr.f32.vlgmr.msra.gmra.mrb[36].mxu0 %v2056_v47 }
 0x891   : > { %2172 = vmatprep.mubr.f32.mxu0 %v3811_v9  ;;  %v2095_v9 = vrot.slane %v2090_v57, %v777_v16 }
 0x894   : > { %2173 = vmatmul.mubr.f32.gmra.mrb[38].mxu0 %v2057_v49 }
 0x963   : > { %v2168_v59 = vpop.f32.mrb[36].mxu0 }
 0x964   : > { %v2169_v60 = vadd.f32 %v2168_v59, %v2095_v9  ;;  %v2170_v61 = vpop.f32.mrb[37].mxu0 }
 0x965   : > { %v2171_v62 = vadd.f32 %v2170_v61, %v2099_v58 }
 0x966   : > { %v2179_v1 = vmax.f32 %v2169_v60, 0.0 }
 0x967   : > { %v2180_v63 = vmax.f32 %v2171_v62, 0.0  ;;  %v2174_v0 = vpop.f32.mrb[38].mxu0 }
 0x968   : > { %v2175_v10 = vadd.f32 %v2174_v0, %v2095_v9  ;;  %v2176_v11 = vpop.f32.mrb[39].mxu0 }
 0x969   : > { %v2177_v12 = vadd.f32 %v2176_v11, %v2099_v58  ;;  %2286 = vmatprep.mubr.f32.mxu1 %v2180_v63 }
 0x96a   : > { %2287 = vmatmul.mubr.f32.vlgmr.msra.gmra.mrb[20].mxu1 %v2179_v1  ;;  %v2181_v14 = vmax.f32 %v2175_v10, 0.0 }
 0x96b   : > { %v2182_v13 = vmax.f32 %v2177_v12, 0.0 }
 0x96d   : > { %2291 = vmatprep.mubr.f32.mxu1 %v2182_v13 }
 0x96e   : > { %2292 = vmatmul.mubr.f32.gmra.mrb[22].mxu1 %v2181_v14 }
 0xa3d   : > { %v2839_v16 = vpop.f32.mrb[20].mxu1 }
 0xa3e   : > { %v2840_v18 = vpop.f32.mrb[21].mxu1 }
 0xa3f   : > { %v2841_v17 = vadd.f32 %v2840_v18, %v2839_v16 }
 0xa41   : > { %v2289_v19 = vadd.f32 %v2841_v17, %v2664_v15  ;;  %v2842_v20 = vpop.f32.mrb[22].mxu1 }
 0xa42   : > { %v2843_v21 = vpop.f32.mrb[23].mxu1 }
 0xa43   : > { %v2844_v22 = vadd.f32 %v2843_v21, %v2842_v20  ;;  %v2297_v23 = vadd.f32 %v2289_v19, %v2056_v47 }
 0xa45   : > { %v2294_v24 = vadd.f32 %v2844_v22, %v2664_v15  ;;  %2299 = vadd.xlane.f32.xlu1 %v2297_v23 }
 0xa47   : > { %v2298_v25 = vadd.f32 %v2294_v24, %v2057_v49 }
 0xa49   : > { %2301 = vadd.xlane.f32.xlu1 %v2298_v25 }
 0xa5a   : > { %1609 = vrot.lane.b32.xlu1 %v4443_v34, %s3816_s23 }
 0xa5e   : > { %1615 = vrot.lane.b32.xlu1 %v4440_v32, %s3817_s27 }
 0xa62   : > { %1621 = vrot.lane.b32.xlu1 %v4453_v38, %s3813_s14 }
 0xa66   : > { %1627 = vrot.lane.b32.xlu1 %v4450_v37, %s3818_s28 }
 0xa6a   : > { %1633 = vrot.lane.b32.xlu1 %v4463_v42, %s3819_s0 }
 0xad2   : > { %v2300_v26 = vpop.xlane.xlu1 %2299 }
 0xad3   : > { %v2304_v27 = vmul.f32 0.0078125, %v2300_v26 }
 0xad5   : > { %v2306_v28 = vsub.f32 %v2297_v23, %v2304_v27 }
 0xad6   : > { %v2302_v34 = vpop.xlane.xlu1 %2301 }
 0xad7   : > { %v2305_v33 = vmul.f32 0.0078125, %v2302_v34  ;;  %v2308_v2 = vmul.f32 %v2306_v28, %v2306_v28 }
 0xad9   : > { %v2307_v32 = vsub.f32 %v2298_v25, %v2305_v33  ;;  %2310 = vadd.xlane.f32.xlu1 %v2308_v2 }
 0xada   : > { %v1610_v3 = vpop.permute.xlu1 %1609 }
 0xadb   : > { %2641 = vst.msk [vmem:[%s4211_s15 + $0x10] sm:$0xff] %vm1600_vm3, %v1610_v3  ;;  %v2309_v38 = vmul.f32 %v2307_v32, %v2307_v32 }
 0xadd   : > { %2312 = vadd.xlane.f32.xlu1 %v2309_v38 }
 0xade   : > { %v1616_v37 = vpop.permute.xlu1 %1615 }
 0xadf   : > { %2642 = vst.msk [vmem:[%s4211_s15 + $0x18] sm:$0xff] %vm1600_vm3, %v1616_v37 }
 0xae2   : > { %v1622_v42 = vpop.permute.xlu1 %1621 }
 0xae3   : > { %2643 = vst.msk [vmem:[%s4211_s15 + $0x20] sm:$0xff] %vm1600_vm3, %v1622_v42 }
 0xae6   : > { %v1628_v5 = vpop.permute.xlu1 %1627 }
 0xae7   : > { %2644 = vst.msk [vmem:[%s4211_s15 + $0x28] sm:$0xff] %vm1600_vm3, %v1628_v5 }
 0xaea   : > { %v1634_v6 = vpop.permute.xlu1 %1633 }
 0xaeb   : > { %2645 = vst.msk [vmem:[%s4211_s15 + $0x30] sm:$0xff] %vm1600_vm3, %v1634_v6 }
 0xaee   : > { %1639 = vrot.lane.b32.xlu1 %v4460_v41, %s3820_s10  ;;  %v2666_v41 = vld [vmem:[%s607_s29] ss:$0 sm:$0xff] }
 0xb66   : > { %v2311_v29 = vpop.xlane.xlu1 %2310 }
 0xb67   : > { %v2314_v8 = vmul.f32 0.0078125, %v2311_v29 }
 0xb69   : > { %v2316_v30 = vadd.f32 1e-05, %v2314_v8 }
 0xb6a   : > { %v2313_v31 = vpop.xlane.xlu1 %2312 }
 0xb6b   : > { %3543 = vrsqrt.f32 %v2316_v30  ;;  %v2315_v35 = vmul.f32 0.0078125, %v2313_v31 }
 0xb6d   : > { %v2317_v36 = vadd.f32 1e-05, %v2315_v35 }
 0xb6e   : > { %v1640_v39 = vpop.permute.xlu1 %1639 }
 0xb6f   : > { %3545 = vrsqrt.f32 %v2317_v36  ;;  %2646 = vst.msk [vmem:[%s4211_s15 + $0x38] sm:$0xff] %vm1600_vm3, %v1640_v39 }
 0xb75   : > { %v3544_v40 = vpop.eup %3543 }
 0xb76   : > { %v2320_v44 = vmul.f32 %v3544_v40, %v2306_v28 }
 0xb78   : > { %v2329_v45 = vmul.f32 %v2665_v43, %v2320_v44 }
 0xb79   : > { %v3546_v46 = vpop.eup %3545 }
 0xb7a   : > { %v2321_v47 = vmul.f32 %v3546_v46, %v2307_v32  ;;  %v2338_v48 = vadd.f32 %v2666_v41, %v2329_v45 }
 0xb7c   : > { %v2330_v49 = vmul.f32 %v2665_v43, %v2321_v47  ;;  %2340 = vst [vmem:[#allocation2] sm:$0xff] %v2338_v48  ;;  %2342 = vst [vmem:[#allocation12] sm:$0xff] %v2338_v48 }
 0xb7e   : > { %v2339_v4 = vadd.f32 %v2666_v41, %v2330_v49 }
 0xb80   : > { %2341 = vst [vmem:[#allocation2 + $0x8] sm:$0xff] %v2339_v4  ;;  %2343 = vst [vmem:[#allocation12 + $0x8] sm:$0xff] %v2339_v4 }
 0xb81   : > { %3738 = shalt.err (!%p3735_p2)
}
 0xb82   : > { %s4738_s15 = sld [smem:[#allocation30_spill]] }
 0xb88   : > { %s4739_s7 = smov %s4738_s15  ;;  %s3739_s29 = scalar_lea.hbm %s4738_s15, 256 }
 0xb89   : > { %p3740_p9 = scmp.ne.s32.totalorder %s4739_s7, %s3739_s29  ;;  %p3745_p0 = scmp.lt.u32.totalorder %s3739_s29, %s4739_s7 }
 0xb8b   : > { %p3741_p6 = pnand %p3740_p9, %p3396_p5 }
 0xb8d   : > { %p3742_p4 = pneg %p3741_p6 }
 0xb8f   : > { %p3747_p7 = pnand %p3745_p0, %p3742_p4 }
 0xb91   : > { %3750 = shalt.err (!%p3747_p7)
}
 0xb92   : > { %s3822_s16 = smov 128   ;;  %s3823_s19 = smov 8  }
 0xb93   : > { %3368 = dma.vmem_to_hbm [thread:$0]  (%p3396_p5), %s2356_s5, 256, %s4739_s7, [#allocation5], %s3822_s16, %s3822_s16, %s3823_s19  }
 0xb94   : > { %3780 = dma.done.wait (%p3396_p5), [#allocation5], 256  }
 0xb95   : > { %3782 = vsyncadd (%p3396_p5), [#allocation5], 4294967040 }
 0xb96 PF: > { %s4740_s16 = sld [smem:[#allocation18_spill]]  ;;  %s4741_s13 = sld [smem:[#allocation17_spill]] }
 0xb97   : > { %s4742_s15 = sld [smem:[#allocation19_spill]]  ;;  %s4743_s29 = smov %s3789_s30 }
 0xb9c   : > { %p25_p13 = scmp.ge.s32.totalorder %s4740_s16, 4   ;;  %s4744_s30 = smov %s4741_s13 }
 0xb9e   :  { %27 = sbr.rel (!%p25_p13) target bundleno = 17 (0x11), region = 190 }
 0xba5   :  { %2382 = vsyncpa [#allocation4], 1 }
 0xba6   :  { %2384 = vsyncpa [#allocation4 + $0x1], 1 }
 0xba7   :  { %2385 = vsyncpa [#allocation7], 1 }
 0xba8   :  { %2386 = vsyncpa [#allocation5], 1 }
 0xba9   :  { %2388 = vsyncpa [#allocation5 + $0x1], 1 }

</bundles_post_ra>
